<compile_context>
chip_gen: v7x
topology: tpu7x:2x2x1
jax: 0.10.0
libtpu: 0.0.40
codegen_flags: <defaults>
</compile_context>

<pallas_src>
import functools

import jax
import jax.numpy as jnp
from jax import lax
from jax.experimental import pallas as pl
from jax.experimental.pallas import tpu as pltpu


def _round_up(x, m):
    return ((x + m - 1) // m) * m


# --------------------------------------------------------------------------- #
# Kernel 1: serial recurrence (attention + GRU cell), one invocation, in-kernel
# unrolled time loop.  Emits the hidden state for every step: (T, B, H).
# --------------------------------------------------------------------------- #
def _decoder_recurrent_kernel(aenc_ref, enc_ref, giw_ref, h0_ref,
                              w1h_ref, w2_ref, wihc_ref, whh_ref, bhh_ref,
                              h_all_ref):
    B, S, H = enc_ref.shape
    T = h_all_ref.shape[0]

    # Loop-invariant operands loaded once (tiny; stay resident).
    enc = enc_ref[...].astype(jnp.float32)                  # (B, S, H)
    aenc = aenc_ref[...].astype(jnp.float32)                # (B, S, H) = enc@W1e + b1
    w1h = w1h_ref[...]                                      # (H, H)
    w2 = w2_ref[...].reshape(1, 1, H)                       # (1, 1, H)
    wihc = wihc_ref[...]                                    # (H, 3H)
    whh = whh_ref[...]                                      # (H, 3H)
    bhh = bhh_ref[...]                                      # (1, 3H)

    def step(t, h):
        # ---------------- Attention ----------------
        a_hid = jnp.dot(h, w1h, preferred_element_type=jnp.float32)       # (B, H)
        a = jnp.tanh(aenc + a_hid[:, None, :])                            # (B, S, H)
        e = jnp.sum(a * w2, axis=-1)                                      # (B, S)
        e_max = jnp.max(e, axis=-1, keepdims=True)
        p = jnp.exp(e - e_max)
        denom = jnp.sum(p, axis=-1, keepdims=True)
        # EUP approx reciprocal + one Newton refinement (keeps f32 accuracy
        # while avoiding the full VALU Newton sequence of approx=False).
        r_inv = pl.reciprocal(denom, approx=True)
        r_inv = r_inv * (2.0 - denom * r_inv)
        alpha = p * r_inv                                                 # (B, S)
        context = jnp.sum(alpha[:, :, None] * enc, axis=1)                # (B, H)

        # ------------- GRU step (PyTorch gate order: r, z, n) -------------
        # Input-side word projection (gi_w) was hoisted; only the context part
        # and the recurrent part remain in the loop.
        gi = giw_ref[t] + jnp.dot(context, wihc,
                                  preferred_element_type=jnp.float32)     # (B, 3H)
        gh = jnp.dot(h, whh, preferred_element_type=jnp.float32) + bhh    # (B, 3H)

        r = jax.nn.sigmoid(gi[:, :H] + gh[:, :H])
        z = jax.nn.sigmoid(gi[:, H:2 * H] + gh[:, H:2 * H])
        n = jnp.tanh(gi[:, 2 * H:] + r * gh[:, 2 * H:])
        h_new = (1.0 - z) * n + z * h

        h_all_ref[t] = h_new.astype(h_all_ref.dtype)
        return h_new

    lax.fori_loop(0, T, step, h0_ref[...].astype(jnp.float32), unroll=True)


# --------------------------------------------------------------------------- #
# Kernel 2: batched output projection + log_softmax over all T*B rows.
# Rows are tiled ("parallel"); vocab is pre-padded to a multiple of 128 so the
# output store is lane-dense.
# --------------------------------------------------------------------------- #
def _project_logsoftmax_kernel(h_ref, wout_ref, bout_ref, out_ref):
    logits = jnp.dot(h_ref[...], wout_ref[...],
                     preferred_element_type=jnp.float32) + bout_ref[...]   # (tm, Vp)
    m = jnp.max(logits, axis=-1, keepdims=True)
    lse = jnp.log(jnp.sum(jnp.exp(logits - m), axis=-1, keepdims=True)) + m
    out_ref[...] = (logits - lse).astype(out_ref.dtype)


def decoder_rnn_forward(encoder_outputs, encoder_hidden, targets, params, max_length):
    """Train-mode forward of DecoderRNN. Returns seq_logprobs (B, T, V)."""
    B, S, H = encoder_outputs.shape
    V, W = params["embedding"].shape
    T = max_length - 1
    G = 3 * H

    enc = encoder_outputs.astype(jnp.float32)
    h0 = encoder_hidden[0].astype(jnp.float32)                        # (B, H)

    # ---- hoisted, time-invariant projections (done once, outside the loop) ----
    a_enc = (enc.reshape(B * S, H) @ params["w1e"]
             + params["b1"]).reshape(B, S, H)                          # (B, S, H)
    emb = params["embedding"][targets]                                 # (B, L, W) glue
    xt = jnp.transpose(emb[:, :T, :], (1, 0, 2))                       # (T, B, W)
    gi_w = (xt.reshape(T * B, W) @ params["wih_w"]
            + params["bih"]).reshape(T, B, G)                          # (T, B, 3H)

    full2 = lambda i: (0, 0)
    full3 = lambda i: (0, 0, 0)

    # ---- kernel 1: serial recurrence, single pallas_call invocation ----
    h_all = pl.pallas_call(
        _decoder_recurrent_kernel,
        out_shape=jax.ShapeDtypeStruct((T, B, H), jnp.float32),
        grid_spec=pltpu.PrefetchScalarGridSpec(
            num_scalar_prefetch=0,
            grid=(1,),
            in_specs=[
                pl.BlockSpec((B, S, H), full3),    # a_enc  (enc part of attn linear1 + b1)
                pl.BlockSpec((B, S, H), full3),    # encoder_outputs
                pl.BlockSpec((T, B, G), full3),    # gi_w   (hoisted word-side GRU proj + bih)
                pl.BlockSpec((B, H), full2),       # h0
                pl.BlockSpec((H, H), full2),       # w1h    (hidden part of attn linear1)
                pl.BlockSpec((1, H), full2),       # w2     (attn linear2)
                pl.BlockSpec((H, G), full2),       # wih_c  (context part of GRU weight_ih)
                pl.BlockSpec((H, G), full2),       # whh
                pl.BlockSpec((1, G), full2),       # bhh
            ],
            out_specs=pl.BlockSpec((T, B, H), full3),
        ),
        compiler_params=pltpu.CompilerParams(dimension_semantics=("arbitrary",)),
    )(a_enc, enc, gi_w, h0,
      params["w1h"], params["w2"], params["wih_c"], params["whh"], params["bhh"])

    # ---- kernel 2: batched projection + log_softmax, parallel over row tiles ----
    NR = T * B
    tm = min(256, _round_up(NR, 8))
    NRp = _round_up(NR, tm)
    Vp = _round_up(V, 128)                                             # lane-dense output

    h_flat = h_all.reshape(NR, H)
    if NRp != NR:
        h_flat = jnp.pad(h_flat, ((0, NRp - NR), (0, 0)))
    wout = params["wout"]
    bout = params["bout"]
    if Vp != V:
        wout = jnp.pad(wout, ((0, 0), (0, Vp - V)))
        # padded vocab columns get a huge negative bias so they vanish in softmax
        bout = jnp.pad(bout, ((0, 0), (0, Vp - V)), constant_values=-1e30)

    logp = pl.pallas_call(
        _project_logsoftmax_kernel,
        out_shape=jax.ShapeDtypeStruct((NRp, Vp), jnp.float32),
        grid_spec=pltpu.PrefetchScalarGridSpec(
            num_scalar_prefetch=0,
            grid=(NRp // tm,),
            in_specs=[
                pl.BlockSpec((tm, H), lambda i: (i, 0)),   # hidden rows
                pl.BlockSpec((H, Vp), lambda i: (0, 0)),   # wout
                pl.BlockSpec((1, Vp), lambda i: (0, 0)),   # bout
            ],
            out_specs=pl.BlockSpec((tm, Vp), lambda i: (i, 0)),
        ),
        compiler_params=pltpu.CompilerParams(dimension_semantics=("parallel",)),
    )(h_flat, wout, bout)

    logp = logp[:NR, :V].reshape(T, B, V)
    return jnp.transpose(logp, (1, 0, 2))                              # (B, T, V)


def reference_forward(encoder_outputs, encoder_hidden, targets, params, max_length):
    """Pure-JAX reference mirroring the PyTorch train-mode semantics."""
    B, S, H = encoder_outputs.shape
    T = max_length - 1
    emb = params["embedding"][targets]
    h = encoder_hidden[0]
    outs = []
    for t in range(T):
        xt = emb[:, t, :]
        # attention
        a = jnp.tanh(encoder_outputs @ params["w1e"] + (h @ params["w1h"])[:, None, :]
                     + params["b1"][0])
        e = jnp.sum(a * params["w2"][0], axis=-1)
        alpha = jax.nn.softmax(e, axis=1)
        context = jnp.einsum("bs,bsh->bh", alpha, encoder_outputs)
        # gru
        gi = xt @ params["wih_w"] + context @ params["wih_c"] + params["bih"][0]
        gh = h @ params["whh"] + params["bhh"][0]
        r = jax.nn.sigmoid(gi[:, :H] + gh[:, :H])
        z = jax.nn.sigmoid(gi[:, H:2 * H] + gh[:, H:2 * H])
        n = jnp.tanh(gi[:, 2 * H:] + r * gh[:, 2 * H:])
        h = (1.0 - z) * n + z * h
        logits = h @ params["wout"] + params["bout"][0]
        outs.append(jax.nn.log_softmax(logits, axis=-1))
    return jnp.stack(outs, axis=1)


def make_params(key, vocab, dim_word, dim_hidden):
    H, W, V = dim_hidden, dim_word, vocab
    ks = jax.random.split(key, 12)
    s = 0.1
    return {
        "embedding": jax.random.normal(ks[0], (V, W), jnp.float32) * s,
        # Attention.linear1 (2H -> H), split into enc / hidden halves, pre-transposed
        "w1e": jax.random.normal(ks[1], (H, H), jnp.float32) * s,
        "w1h": jax.random.normal(ks[2], (H, H), jnp.float32) * s,
        "b1": jax.random.normal(ks[3], (1, H), jnp.float32) * s,
        # Attention.linear2 (H -> 1, no bias)
        "w2": jax.random.normal(ks[4], (1, H), jnp.float32) * s,
        # GRU weight_ih (input = [word(W) | context(H)]) pre-transposed to (in, 3H)
        "wih_w": jax.random.normal(ks[5], (W, 3 * H), jnp.float32) * s,
        "wih_c": jax.random.normal(ks[6], (H, 3 * H), jnp.float32) * s,
        "whh": jax.random.normal(ks[7], (H, 3 * H), jnp.float32) * s,
        "bih": jax.random.normal(ks[8], (1, 3 * H), jnp.float32) * s,
        "bhh": jax.random.normal(ks[9], (1, 3 * H), jnp.float32) * s,
        # out: Linear(H -> V), pre-transposed
        "wout": jax.random.normal(ks[10], (H, V), jnp.float32) * s,
        "bout": jax.random.normal(ks[11], (1, V), jnp.float32) * s,
    }


if __name__ == "__main__":
    B, S, H, W, V, L = 2, 8, 32, 16, 64, 5   # batch, seq, dim_hidden, dim_word, vocab, max_len

    key = jax.random.PRNGKey(0)
    kp, ke, kh, kt = jax.random.split(key, 4)

    params = make_params(kp, V, W, H)
    encoder_outputs = jax.random.normal(ke, (B, S, H), jnp.float32)
    encoder_hidden = jax.random.normal(kh, (1, B, H), jnp.float32)
    targets = jax.random.randint(kt, (B, L), 0, V, dtype=jnp.int32)

    fwd = jax.jit(functools.partial(decoder_rnn_forward, max_length=L))
    seq_logprobs = fwd(encoder_outputs, encoder_hidden, targets, params)
    seq_logprobs = jax.block_until_ready(seq_logprobs)

    ref = reference_forward(encoder_outputs, encoder_hidden, targets, params, L)
    assert seq_logprobs.shape == (B, L - 1, V)
    # 5e-4 slack: attention softmax uses the EUP approx reciprocal (+1 Newton step).
    assert jnp.max(jnp.abs(seq_logprobs - ref)) < 5e-4, "mismatch vs reference"

    print("KERNEL_OK")
</pallas_src>

<mosaic_0001>
module attributes {stable_mosaic.version = 11 : i64} {
  func.func @_project_logsoftmax_kernel(%arg0: i32, %arg1: memref<8x32xf32, #tpu.memory_space<vmem>>, %arg2: memref<32x128xf32, #tpu.memory_space<vmem>>, %arg3: memref<1x128xf32, #tpu.memory_space<vmem>>, %arg4: memref<8x128xf32, #tpu.memory_space<vmem>>) attributes {dimension_semantics = [#tpu.dimension_semantics<parallel>], iteration_bounds = array<i64: 1>, scalar_prefetch = 0 : i64, scratch_operands = 0 : i64, tpu.core_type = #tpu.core_type<tc>, window_params = [{transform_indices = @transform_0, window_bounds = array<i64: 8, 32>}, {pipeline_mode = #tpu.pipeline_mode<synchronous>, transform_indices = @transform_1, window_bounds = array<i64: 32, 128>}, {pipeline_mode = #tpu.pipeline_mode<synchronous>, transform_indices = @transform_2, window_bounds = array<i64: 1, 128>}, {transform_indices = @transform_3, window_bounds = array<i64: 8, 128>}]} {
    %c0 = arith.constant 0 : index
    %c0_0 = arith.constant 0 : index
    %0 = vector.load %arg1[%c0, %c0_0] : memref<8x32xf32, #tpu.memory_space<vmem>>, vector<8x32xf32>
    %c0_1 = arith.constant 0 : index
    %c0_2 = arith.constant 0 : index
    %1 = vector.load %arg2[%c0_1, %c0_2] : memref<32x128xf32, #tpu.memory_space<vmem>>, vector<32x128xf32>
    %cst = arith.constant dense<0.000000e+00> : vector<8x128xf32>
    %2 = tpu.matmul %0, %1, %cst {dimension_numbers = #tpu.dot_dimension_numbers<[1], [0], [0], [1], [0, 0, 1, 1], [], []>} : vector<8x32xf32>, vector<32x128xf32>, vector<8x128xf32> -> vector<8x128xf32>
    %c0_3 = arith.constant 0 : index
    %c0_4 = arith.constant 0 : index
    %3 = vector.load %arg3[%c0_3, %c0_4] : memref<1x128xf32, #tpu.memory_space<vmem>>, vector<1x128xf32>
    %4 = vector.broadcast %3 : vector<1x128xf32> to vector<8x128xf32>
    %5 = arith.addf %2, %4 : vector<8x128xf32>
    %cst_5 = arith.constant dense<0xFF800000> : vector<8xf32>
    %6 = vector.multi_reduction <maximumf>, %5, %cst_5 [1] : vector<8x128xf32> to vector<8xf32>
    %7 = vector.shape_cast %6 : vector<8xf32> to vector<8x1xf32>
    %8 = vector.broadcast %7 : vector<8x1xf32> to vector<8x128xf32>
    %9 = arith.subf %5, %8 : vector<8x128xf32>
    %10 = math.exp %9 : vector<8x128xf32>
    %cst_6 = arith.constant dense<0.000000e+00> : vector<8xf32>
    %11 = vector.multi_reduction <add>, %10, %cst_6 [1] : vector<8x128xf32> to vector<8xf32>
    %12 = vector.shape_cast %11 : vector<8xf32> to vector<8x1xf32>
    %13 = math.log %12 : vector<8x1xf32>
    %14 = arith.addf %13, %7 : vector<8x1xf32>
    %15 = vector.broadcast %14 : vector<8x1xf32> to vector<8x128xf32>
    %16 = arith.subf %5, %15 : vector<8x128xf32>
    %c0_7 = arith.constant 0 : index
    %c0_8 = arith.constant 0 : index
    %17 = vector.load %arg4[%c0_7, %c0_8] : memref<8x128xf32, #tpu.memory_space<vmem>>, vector<8x128xf32>
    tpu.vector_store %arg4[%c0_7, %c0_8], %16 {strides = array<i32>} : memref<8x128xf32, #tpu.memory_space<vmem>>, vector<8x128xf32>,
    return
  }
  func.func @transform_0(%arg0: i32) -> (i32, i32) {
    %c0_i32 = arith.constant 0 : i32
    %c0_i32_0 = arith.constant 0 : i32
    return %arg0, %c0_i32 : i32, i32
  }
  func.func @transform_1(%arg0: i32) -> (i32, i32) {
    %c0_i32 = arith.constant 0 : i32
    %c0_i32_0 = arith.constant 0 : i32
    %c0_i32_1 = arith.constant 0 : i32
    return %c0_i32, %c0_i32_0 : i32, i32
  }
  func.func @transform_2(%arg0: i32) -> (i32, i32) {
    %c0_i32 = arith.constant 0 : i32
    %c0_i32_0 = arith.constant 0 : i32
    %c0_i32_1 = arith.constant 0 : i32
    return %c0_i32, %c0_i32_0 : i32, i32
  }
  func.func @transform_3(%arg0: i32) -> (i32, i32) {
    %c0_i32 = arith.constant 0 : i32
    %c0_i32_0 = arith.constant 0 : i32
    return %arg0, %c0_i32 : i32, i32
  }
}

module attributes {stable_mosaic.version = 11 : i64} {
  func.func @_decoder_recurrent_kernel(%arg0: i32, %arg1: memref<2x8x32xf32, #tpu.memory_space<vmem>>, %arg2: memref<2x8x32xf32, #tpu.memory_space<vmem>>, %arg3: memref<4x2x96xf32, #tpu.memory_space<vmem>>, %arg4: memref<2x32xf32, #tpu.memory_space<vmem>>, %arg5: memref<32x32xf32, #tpu.memory_space<vmem>>, %arg6: memref<1x32xf32, #tpu.memory_space<vmem>>, %arg7: memref<32x96xf32, #tpu.memory_space<vmem>>, %arg8: memref<32x96xf32, #tpu.memory_space<vmem>>, %arg9: memref<1x96xf32, #tpu.memory_space<vmem>>, %arg10: memref<4x2x32xf32, #tpu.memory_space<vmem>>) attributes {dimension_semantics = [#tpu.dimension_semantics<arbitrary>], iteration_bounds = array<i64: 1>, scalar_prefetch = 0 : i64, scratch_operands = 0 : i64, tpu.core_type = #tpu.core_type<tc>, window_params = [{pipeline_mode = #tpu.pipeline_mode<synchronous>, transform_indices = @transform_0, window_bounds = array<i64: 2, 8, 32>}, {pipeline_mode = #tpu.pipeline_mode<synchronous>, transform_indices = @transform_1, window_bounds = array<i64: 2, 8, 32>}, {pipeline_mode = #tpu.pipeline_mode<synchronous>, transform_indices = @transform_2, window_bounds = array<i64: 4, 2, 96>}, {pipeline_mode = #tpu.pipeline_mode<synchronous>, transform_indices = @transform_3, window_bounds = array<i64: 2, 32>}, {pipeline_mode = #tpu.pipeline_mode<synchronous>, transform_indices = @transform_4, window_bounds = array<i64: 32, 32>}, {pipeline_mode = #tpu.pipeline_mode<synchronous>, transform_indices = @transform_5, window_bounds = array<i64: 1, 32>}, {pipeline_mode = #tpu.pipeline_mode<synchronous>, transform_indices = @transform_6, window_bounds = array<i64: 32, 96>}, {pipeline_mode = #tpu.pipeline_mode<synchronous>, transform_indices = @transform_7, window_bounds = array<i64: 32, 96>}, {pipeline_mode = #tpu.pipeline_mode<synchronous>, transform_indices = @transform_8, window_bounds = array<i64: 1, 96>}, {pipeline_mode = #tpu.pipeline_mode<synchronous>, transform_indices = @transform_9, window_bounds = array<i64: 4, 2, 32>}]} {
    %c0 = arith.constant 0 : index
    %c0_0 = arith.constant 0 : index
    %c0_1 = arith.constant 0 : index
    %0 = vector.load %arg2[%c0, %c0_0, %c0_1] : memref<2x8x32xf32, #tpu.memory_space<vmem>>, vector<2x8x32xf32>
    %c0_2 = arith.constant 0 : index
    %c0_3 = arith.constant 0 : index
    %c0_4 = arith.constant 0 : index
    %1 = vector.load %arg1[%c0_2, %c0_3, %c0_4] : memref<2x8x32xf32, #tpu.memory_space<vmem>>, vector<2x8x32xf32>
    %c0_5 = arith.constant 0 : index
    %c0_6 = arith.constant 0 : index
    %2 = vector.load %arg5[%c0_5, %c0_6] : memref<32x32xf32, #tpu.memory_space<vmem>>, vector<32x32xf32>
    %c0_7 = arith.constant 0 : index
    %c0_8 = arith.constant 0 : index
    %3 = vector.load %arg6[%c0_7, %c0_8] : memref<1x32xf32, #tpu.memory_space<vmem>>, vector<1x32xf32>
    %4 = vector.shape_cast %3 : vector<1x32xf32> to vector<1x1x32xf32>
    %c0_9 = arith.constant 0 : index
    %c0_10 = arith.constant 0 : index
    %5 = vector.load %arg7[%c0_9, %c0_10] : memref<32x96xf32, #tpu.memory_space<vmem>>, vector<32x96xf32>
    %c0_11 = arith.constant 0 : index
    %c0_12 = arith.constant 0 : index
    %6 = vector.load %arg8[%c0_11, %c0_12] : memref<32x96xf32, #tpu.memory_space<vmem>>, vector<32x96xf32>
    %c0_13 = arith.constant 0 : index
    %c0_14 = arith.constant 0 : index
    %7 = vector.load %arg9[%c0_13, %c0_14] : memref<1x96xf32, #tpu.memory_space<vmem>>, vector<1x96xf32>
    %c0_15 = arith.constant 0 : index
    %c0_16 = arith.constant 0 : index
    %8 = vector.load %arg4[%c0_15, %c0_16] : memref<2x32xf32, #tpu.memory_space<vmem>>, vector<2x32xf32>
    %c0_i32 = arith.constant 0 : i32
    %cst = arith.constant dense<0.000000e+00> : vector<2x32xf32>
    %9 = tpu.matmul %8, %2, %cst {dimension_numbers = #tpu.dot_dimension_numbers<[1], [0], [0], [1], [0, 0, 1, 1], [], []>} : vector<2x32xf32>, vector<32x32xf32>, vector<2x32xf32> -> vector<2x32xf32>
    %10 = vector.shape_cast %9 : vector<2x32xf32> to vector<2x1x32xf32>
    %11 = vector.broadcast %10 : vector<2x1x32xf32> to vector<2x8x32xf32>
    %12 = arith.addf %1, %11 : vector<2x8x32xf32>
    %13 = math.tanh %12 : vector<2x8x32xf32>
    %14 = vector.broadcast %4 : vector<1x1x32xf32> to vector<2x8x32xf32>
    %15 = arith.mulf %13, %14 : vector<2x8x32xf32>
    %cst_17 = arith.constant dense<0.000000e+00> : vector<2x8xf32>
    %16 = vector.multi_reduction <add>, %15, %cst_17 [2] : vector<2x8x32xf32> to vector<2x8xf32>
    %cst_18 = arith.constant dense<0xFF800000> : vector<2xf32>
    %17 = vector.multi_reduction <maximumf>, %16, %cst_18 [1] : vector<2x8xf32> to vector<2xf32>
    %18 = vector.shape_cast %17 : vector<2xf32> to vector<2x1xf32>
    %19 = vector.broadcast %18 : vector<2x1xf32> to vector<2x8xf32>
    %20 = arith.subf %16, %19 : vector<2x8xf32>
    %21 = math.exp %20 : vector<2x8xf32>
    %cst_19 = arith.constant dense<0.000000e+00> : vector<2xf32>
    %22 = vector.multi_reduction <add>, %21, %cst_19 [1] : vector<2x8xf32> to vector<2xf32>
    %23 = vector.shape_cast %22 : vector<2xf32> to vector<2x1xf32>
    %24 = tpu.reciprocal %23 {approx = true} : vector<2x1xf32> -> vector<2x1xf32>
    %25 = arith.mulf %23, %24 : vector<2x1xf32>
    %cst_20 = arith.constant 2.000000e+00 : f32
    %26 = vector.broadcast %cst_20 : f32 to vector<2x1xf32>
    %27 = arith.subf %26, %25 : vector<2x1xf32>
    %28 = arith.mulf %24, %27 : vector<2x1xf32>
    %29 = vector.broadcast %28 : vector<2x1xf32> to vector<2x8xf32>
    %30 = arith.mulf %21, %29 : vector<2x8xf32>
    %31 = vector.shape_cast %30 : vector<2x8xf32> to vector<2x8x1xf32>
    %32 = vector.broadcast %31 : vector<2x8x1xf32> to vector<2x8x32xf32>
    %33 = arith.mulf %32, %0 : vector<2x8x32xf32>
    %cst_21 = arith.constant dense<0.000000e+00> : vector<2x32xf32>
    %34 = vector.multi_reduction <add>, %33, %cst_21 [1] : vector<2x8x32xf32> to vector<2x32xf32>
    %35 = arith.index_cast %c0_i32 : i32 to index
    %c0_22 = arith.constant 0 : index
    %c0_23 = arith.constant 0 : index
    %36 = vector.load %arg3[%35, %c0_22, %c0_23] : memref<4x2x96xf32, #tpu.memory_space<vmem>>, vector<1x2x96xf32>
    %37 = vector.shape_cast %36 : vector<1x2x96xf32> to vector<2x96xf32>
    %cst_24 = arith.constant dense<0.000000e+00> : vector<2x96xf32>
    %38 = tpu.matmul %34, %5, %cst_24 {dimension_numbers = #tpu.dot_dimension_numbers<[1], [0], [0], [1], [0, 0, 1, 1], [], []>} : vector<2x32xf32>, vector<32x96xf32>, vector<2x96xf32> -> vector<2x96xf32>
    %39 = arith.addf %37, %38 : vector<2x96xf32>
    %cst_25 = arith.constant dense<0.000000e+00> : vector<2x96xf32>
    %40 = tpu.matmul %8, %6, %cst_25 {dimension_numbers = #tpu.dot_dimension_numbers<[1], [0], [0], [1], [0, 0, 1, 1], [], []>} : vector<2x32xf32>, vector<32x96xf32>, vector<2x96xf32> -> vector<2x96xf32>
    %41 = vector.broadcast %7 : vector<1x96xf32> to vector<2x96xf32>
    %42 = arith.addf %40, %41 : vector<2x96xf32>
    %43 = vector.extract_strided_slice %39 {offsets = [0, 0], sizes = [2, 32], strides = [1, 1]} : vector<2x96xf32> to vector<2x32xf32>
    %44 = vector.extract_strided_slice %42 {offsets = [0, 0], sizes = [2, 32], strides = [1, 1]} : vector<2x96xf32> to vector<2x32xf32>
    %45 = arith.addf %43, %44 : vector<2x32xf32>
    %46 = arith.negf %45 : vector<2x32xf32>
    %47 = math.exp %46 : vector<2x32xf32>
    %cst_26 = arith.constant 1.000000e+00 : f32
    %48 = vector.broadcast %cst_26 : f32 to vector<2x32xf32>
    %49 = arith.addf %48, %47 : vector<2x32xf32>
    %50 = arith.divf %48, %49 : vector<2x32xf32>
    %51 = vector.extract_strided_slice %39 {offsets = [0, 32], sizes = [2, 32], strides = [1, 1]} : vector<2x96xf32> to vector<2x32xf32>
    %52 = vector.extract_strided_slice %42 {offsets = [0, 32], sizes = [2, 32], strides = [1, 1]} : vector<2x96xf32> to vector<2x32xf32>
    %53 = arith.addf %51, %52 : vector<2x32xf32>
    %54 = arith.negf %53 : vector<2x32xf32>
    %55 = math.exp %54 : vector<2x32xf32>
    %cst_27 = arith.constant 1.000000e+00 : f32
    %56 = vector.broadcast %cst_27 : f32 to vector<2x32xf32>
    %57 = arith.addf %56, %55 : vector<2x32xf32>
    %58 = arith.divf %56, %57 : vector<2x32xf32>
    %59 = vector.extract_strided_slice %39 {offsets = [0, 64], sizes = [2, 32], strides = [1, 1]} : vector<2x96xf32> to vector<2x32xf32>
    %60 = vector.extract_strided_slice %42 {offsets = [0, 64], sizes = [2, 32], strides = [1, 1]} : vector<2x96xf32> to vector<2x32xf32>
    %61 = arith.mulf %50, %60 : vector<2x32xf32>
    %62 = arith.addf %59, %61 : vector<2x32xf32>
    %63 = math.tanh %62 : vector<2x32xf32>
    %cst_28 = arith.constant 1.000000e+00 : f32
    %64 = vector.broadcast %cst_28 : f32 to vector<2x32xf32>
    %65 = arith.subf %64, %58 : vector<2x32xf32>
    %66 = arith.mulf %65, %63 : vector<2x32xf32>
    %67 = arith.mulf %58, %8 : vector<2x32xf32>
    %68 = arith.addf %66, %67 : vector<2x32xf32>
    %69 = arith.index_cast %c0_i32 : i32 to index
    %c0_29 = arith.constant 0 : index
    %c0_30 = arith.constant 0 : index
    %70 = vector.load %arg10[%69, %c0_29, %c0_30] : memref<4x2x32xf32, #tpu.memory_space<vmem>>, vector<1x2x32xf32>
    %71 = vector.shape_cast %70 : vector<1x2x32xf32> to vector<2x32xf32>
    %72 = vector.shape_cast %68 : vector<2x32xf32> to vector<1x2x32xf32>
    tpu.vector_store %arg10[%69, %c0_29, %c0_30], %72 {strides = array<i32>} : memref<4x2x32xf32, #tpu.memory_space<vmem>>, vector<1x2x32xf32>,
    %c1_i32 = arith.constant 1 : i32
    %cst_31 = arith.constant dense<0.000000e+00> : vector<2x32xf32>
    %73 = tpu.matmul %68, %2, %cst_31 {dimension_numbers = #tpu.dot_dimension_numbers<[1], [0], [0], [1], [0, 0, 1, 1], [], []>} : vector<2x32xf32>, vector<32x32xf32>, vector<2x32xf32> -> vector<2x32xf32>
    %74 = vector.shape_cast %73 : vector<2x32xf32> to vector<2x1x32xf32>
    %75 = vector.broadcast %74 : vector<2x1x32xf32> to vector<2x8x32xf32>
    %76 = arith.addf %1, %75 : vector<2x8x32xf32>
    %77 = math.tanh %76 : vector<2x8x32xf32>
    %78 = vector.broadcast %4 : vector<1x1x32xf32> to vector<2x8x32xf32>
    %79 = arith.mulf %77, %78 : vector<2x8x32xf32>
    %cst_32 = arith.constant dense<0.000000e+00> : vector<2x8xf32>
    %80 = vector.multi_reduction <add>, %79, %cst_32 [2] : vector<2x8x32xf32> to vector<2x8xf32>
    %cst_33 = arith.constant dense<0xFF800000> : vector<2xf32>
    %81 = vector.multi_reduction <maximumf>, %80, %cst_33 [1] : vector<2x8xf32> to vector<2xf32>
    %82 = vector.shape_cast %81 : vector<2xf32> to vector<2x1xf32>
    %83 = vector.broadcast %82 : vector<2x1xf32> to vector<2x8xf32>
    %84 = arith.subf %80, %83 : vector<2x8xf32>
    %85 = math.exp %84 : vector<2x8xf32>
    %cst_34 = arith.constant dense<0.000000e+00> : vector<2xf32>
    %86 = vector.multi_reduction <add>, %85, %cst_34 [1] : vector<2x8xf32> to vector<2xf32>
    %87 = vector.shape_cast %86 : vector<2xf32> to vector<2x1xf32>
    %88 = tpu.reciprocal %87 {approx = true} : vector<2x1xf32> -> vector<2x1xf32>
    %89 = arith.mulf %87, %88 : vector<2x1xf32>
    %cst_35 = arith.constant 2.000000e+00 : f32
    %90 = vector.broadcast %cst_35 : f32 to vector<2x1xf32>
    %91 = arith.subf %90, %89 : vector<2x1xf32>
    %92 = arith.mulf %88, %91 : vector<2x1xf32>
    %93 = vector.broadcast %92 : vector<2x1xf32> to vector<2x8xf32>
    %94 = arith.mulf %85, %93 : vector<2x8xf32>
    %95 = vector.shape_cast %94 : vector<2x8xf32> to vector<2x8x1xf32>
    %96 = vector.broadcast %95 : vector<2x8x1xf32> to vector<2x8x32xf32>
    %97 = arith.mulf %96, %0 : vector<2x8x32xf32>
    %cst_36 = arith.constant dense<0.000000e+00> : vector<2x32xf32>
    %98 = vector.multi_reduction <add>, %97, %cst_36 [1] : vector<2x8x32xf32> to vector<2x32xf32>
    %99 = arith.index_cast %c1_i32 : i32 to index
    %c0_37 = arith.constant 0 : index
    %c0_38 = arith.constant 0 : index
    %100 = vector.load %arg3[%99, %c0_37, %c0_38] : memref<4x2x96xf32, #tpu.memory_space<vmem>>, vector<1x2x96xf32>
    %101 = vector.shape_cast %100 : vector<1x2x96xf32> to vector<2x96xf32>
    %cst_39 = arith.constant dense<0.000000e+00> : vector<2x96xf32>
    %102 = tpu.matmul %98, %5, %cst_39 {dimension_numbers = #tpu.dot_dimension_numbers<[1], [0], [0], [1], [0, 0, 1, 1], [], []>} : vector<2x32xf32>, vector<32x96xf32>, vector<2x96xf32> -> vector<2x96xf32>
    %103 = arith.addf %101, %102 : vector<2x96xf32>
    %cst_40 = arith.constant dense<0.000000e+00> : vector<2x96xf32>
    %104 = tpu.matmul %68, %6, %cst_40 {dimension_numbers = #tpu.dot_dimension_numbers<[1], [0], [0], [1], [0, 0, 1, 1], [], []>} : vector<2x32xf32>, vector<32x96xf32>, vector<2x96xf32> -> vector<2x96xf32>
    %105 = vector.broadcast %7 : vector<1x96xf32> to vector<2x96xf32>
    %106 = arith.addf %104, %105 : vector<2x96xf32>
    %107 = vector.extract_strided_slice %103 {offsets = [0, 0], sizes = [2, 32], strides = [1, 1]} : vector<2x96xf32> to vector<2x32xf32>
    %108 = vector.extract_strided_slice %106 {offsets = [0, 0], sizes = [2, 32], strides = [1, 1]} : vector<2x96xf32> to vector<2x32xf32>
    %109 = arith.addf %107, %108 : vector<2x32xf32>
    %110 = arith.negf %109 : vector<2x32xf32>
    %111 = math.exp %110 : vector<2x32xf32>
    %cst_41 = arith.constant 1.000000e+00 : f32
    %112 = vector.broadcast %cst_41 : f32 to vector<2x32xf32>
    %113 = arith.addf %112, %111 : vector<2x32xf32>
    %114 = arith.divf %112, %113 : vector<2x32xf32>
    %115 = vector.extract_strided_slice %103 {offsets = [0, 32], sizes = [2, 32], strides = [1, 1]} : vector<2x96xf32> to vector<2x32xf32>
    %116 = vector.extract_strided_slice %106 {offsets = [0, 32], sizes = [2, 32], strides = [1, 1]} : vector<2x96xf32> to vector<2x32xf32>
    %117 = arith.addf %115, %116 : vector<2x32xf32>
    %118 = arith.negf %117 : vector<2x32xf32>
    %119 = math.exp %118 : vector<2x32xf32>
    %cst_42 = arith.constant 1.000000e+00 : f32
    %120 = vector.broadcast %cst_42 : f32 to vector<2x32xf32>
    %121 = arith.addf %120, %119 : vector<2x32xf32>
    %122 = arith.divf %120, %121 : vector<2x32xf32>
    %123 = vector.extract_strided_slice %103 {offsets = [0, 64], sizes = [2, 32], strides = [1, 1]} : vector<2x96xf32> to vector<2x32xf32>
    %124 = vector.extract_strided_slice %106 {offsets = [0, 64], sizes = [2, 32], strides = [1, 1]} : vector<2x96xf32> to vector<2x32xf32>
    %125 = arith.mulf %114, %124 : vector<2x32xf32>
    %126 = arith.addf %123, %125 : vector<2x32xf32>
    %127 = math.tanh %126 : vector<2x32xf32>
    %cst_43 = arith.constant 1.000000e+00 : f32
    %128 = vector.broadcast %cst_43 : f32 to vector<2x32xf32>
    %129 = arith.subf %128, %122 : vector<2x32xf32>
    %130 = arith.mulf %129, %127 : vector<2x32xf32>
    %131 = arith.mulf %122, %68 : vector<2x32xf32>
    %132 = arith.addf %130, %131 : vector<2x32xf32>
    %133 = arith.index_cast %c1_i32 : i32 to index
    %c0_44 = arith.constant 0 : index
    %c0_45 = arith.constant 0 : index
    %134 = vector.load %arg10[%133, %c0_44, %c0_45] : memref<4x2x32xf32, #tpu.memory_space<vmem>>, vector<1x2x32xf32>
    %135 = vector.shape_cast %134 : vector<1x2x32xf32> to vector<2x32xf32>
    %136 = vector.shape_cast %132 : vector<2x32xf32> to vector<1x2x32xf32>
    tpu.vector_store %arg10[%133, %c0_44, %c0_45], %136 {strides = array<i32>} : memref<4x2x32xf32, #tpu.memory_space<vmem>>, vector<1x2x32xf32>,
    %c2_i32 = arith.constant 2 : i32
    %cst_46 = arith.constant dense<0.000000e+00> : vector<2x32xf32>
    %137 = tpu.matmul %132, %2, %cst_46 {dimension_numbers = #tpu.dot_dimension_numbers<[1], [0], [0], [1], [0, 0, 1, 1], [], []>} : vector<2x32xf32>, vector<32x32xf32>, vector<2x32xf32> -> vector<2x32xf32>
    %138 = vector.shape_cast %137 : vector<2x32xf32> to vector<2x1x32xf32>
    %139 = vector.broadcast %138 : vector<2x1x32xf32> to vector<2x8x32xf32>
    %140 = arith.addf %1, %139 : vector<2x8x32xf32>
    %141 = math.tanh %140 : vector<2x8x32xf32>
    %142 = vector.broadcast %4 : vector<1x1x32xf32> to vector<2x8x32xf32>
    %143 = arith.mulf %141, %142 : vector<2x8x32xf32>
    %cst_47 = arith.constant dense<0.000000e+00> : vector<2x8xf32>
    %144 = vector.multi_reduction <add>, %143, %cst_47 [2] : vector<2x8x32xf32> to vector<2x8xf32>
    %cst_48 = arith.constant dense<0xFF800000> : vector<2xf32>
    %145 = vector.multi_reduction <maximumf>, %144, %cst_48 [1] : vector<2x8xf32> to vector<2xf32>
    %146 = vector.shape_cast %145 : vector<2xf32> to vector<2x1xf32>
    %147 = vector.broadcast %146 : vector<2x1xf32> to vector<2x8xf32>
    %148 = arith.subf %144, %147 : vector<2x8xf32>
    %149 = math.exp %148 : vector<2x8xf32>
    %cst_49 = arith.constant dense<0.000000e+00> : vector<2xf32>
    %150 = vector.multi_reduction <add>, %149, %cst_49 [1] : vector<2x8xf32> to vector<2xf32>
    %151 = vector.shape_cast %150 : vector<2xf32> to vector<2x1xf32>
    %152 = tpu.reciprocal %151 {approx = true} : vector<2x1xf32> -> vector<2x1xf32>
    %153 = arith.mulf %151, %152 : vector<2x1xf32>
    %cst_50 = arith.constant 2.000000e+00 : f32
    %154 = vector.broadcast %cst_50 : f32 to vector<2x1xf32>
    %155 = arith.subf %154, %153 : vector<2x1xf32>
    %156 = arith.mulf %152, %155 : vector<2x1xf32>
    %157 = vector.broadcast %156 : vector<2x1xf32> to vector<2x8xf32>
    %158 = arith.mulf %149, %157 : vector<2x8xf32>
    %159 = vector.shape_cast %158 : vector<2x8xf32> to vector<2x8x1xf32>
    %160 = vector.broadcast %159 : vector<2x8x1xf32> to vector<2x8x32xf32>
    %161 = arith.mulf %160, %0 : vector<2x8x32xf32>
    %cst_51 = arith.constant dense<0.000000e+00> : vector<2x32xf32>
    %162 = vector.multi_reduction <add>, %161, %cst_51 [1] : vector<2x8x32xf32> to vector<2x32xf32>
    %163 = arith.index_cast %c2_i32 : i32 to index
    %c0_52 = arith.constant 0 : index
    %c0_53 = arith.constant 0 : index
    %164 = vector.load %arg3[%163, %c0_52, %c0_53] : memref<4x2x96xf32, #tpu.memory_space<vmem>>, vector<1x2x96xf32>
    %165 = vector.shape_cast %164 : vector<1x2x96xf32> to vector<2x96xf32>
    %cst_54 = arith.constant dense<0.000000e+00> : vector<2x96xf32>
    %166 = tpu.matmul %162, %5, %cst_54 {dimension_numbers = #tpu.dot_dimension_numbers<[1], [0], [0], [1], [0, 0, 1, 1], [], []>} : vector<2x32xf32>, vector<32x96xf32>, vector<2x96xf32> -> vector<2x96xf32>
    %167 = arith.addf %165, %166 : vector<2x96xf32>
    %cst_55 = arith.constant dense<0.000000e+00> : vector<2x96xf32>
    %168 = tpu.matmul %132, %6, %cst_55 {dimension_numbers = #tpu.dot_dimension_numbers<[1], [0], [0], [1], [0, 0, 1, 1], [], []>} : vector<2x32xf32>, vector<32x96xf32>, vector<2x96xf32> -> vector<2x96xf32>
    %169 = vector.broadcast %7 : vector<1x96xf32> to vector<2x96xf32>
    %170 = arith.addf %168, %169 : vector<2x96xf32>
    %171 = vector.extract_strided_slice %167 {offsets = [0, 0], sizes = [2, 32], strides = [1, 1]} : vector<2x96xf32> to vector<2x32xf32>
    %172 = vector.extract_strided_slice %170 {offsets = [0, 0], sizes = [2, 32], strides = [1, 1]} : vector<2x96xf32> to vector<2x32xf32>
    %173 = arith.addf %171, %172 : vector<2x32xf32>
    %174 = arith.negf %173 : vector<2x32xf32>
    %175 = math.exp %174 : vector<2x32xf32>
    %cst_56 = arith.constant 1.000000e+00 : f32
    %176 = vector.broadcast %cst_56 : f32 to vector<2x32xf32>
    %177 = arith.addf %176, %175 : vector<2x32xf32>
    %178 = arith.divf %176, %177 : vector<2x32xf32>
    %179 = vector.extract_strided_slice %167 {offsets = [0, 32], sizes = [2, 32], strides = [1, 1]} : vector<2x96xf32> to vector<2x32xf32>
    %180 = vector.extract_strided_slice %170 {offsets = [0, 32], sizes = [2, 32], strides = [1, 1]} : vector<2x96xf32> to vector<2x32xf32>
    %181 = arith.addf %179, %180 : vector<2x32xf32>
    %182 = arith.negf %181 : vector<2x32xf32>
    %183 = math.exp %182 : vector<2x32xf32>
    %cst_57 = arith.constant 1.000000e+00 : f32
    %184 = vector.broadcast %cst_57 : f32 to vector<2x32xf32>
    %185 = arith.addf %184, %183 : vector<2x32xf32>
    %186 = arith.divf %184, %185 : vector<2x32xf32>
    %187 = vector.extract_strided_slice %167 {offsets = [0, 64], sizes = [2, 32], strides = [1, 1]} : vector<2x96xf32> to vector<2x32xf32>
    %188 = vector.extract_strided_slice %170 {offsets = [0, 64], sizes = [2, 32], strides = [1, 1]} : vector<2x96xf32> to vector<2x32xf32>
    %189 = arith.mulf %178, %188 : vector<2x32xf32>
    %190 = arith.addf %187, %189 : vector<2x32xf32>
    %191 = math.tanh %190 : vector<2x32xf32>
    %cst_58 = arith.constant 1.000000e+00 : f32
    %192 = vector.broadcast %cst_58 : f32 to vector<2x32xf32>
    %193 = arith.subf %192, %186 : vector<2x32xf32>
    %194 = arith.mulf %193, %191 : vector<2x32xf32>
    %195 = arith.mulf %186, %132 : vector<2x32xf32>
    %196 = arith.addf %194, %195 : vector<2x32xf32>
    %197 = arith.index_cast %c2_i32 : i32 to index
    %c0_59 = arith.constant 0 : index
    %c0_60 = arith.constant 0 : index
    %198 = vector.load %arg10[%197, %c0_59, %c0_60] : memref<4x2x32xf32, #tpu.memory_space<vmem>>, vector<1x2x32xf32>
    %199 = vector.shape_cast %198 : vector<1x2x32xf32> to vector<2x32xf32>
    %200 = vector.shape_cast %196 : vector<2x32xf32> to vector<1x2x32xf32>
    tpu.vector_store %arg10[%197, %c0_59, %c0_60], %200 {strides = array<i32>} : memref<4x2x32xf32, #tpu.memory_space<vmem>>, vector<1x2x32xf32>,
    %c3_i32 = arith.constant 3 : i32
    %cst_61 = arith.constant dense<0.000000e+00> : vector<2x32xf32>
    %201 = tpu.matmul %196, %2, %cst_61 {dimension_numbers = #tpu.dot_dimension_numbers<[1], [0], [0], [1], [0, 0, 1, 1], [], []>} : vector<2x32xf32>, vector<32x32xf32>, vector<2x32xf32> -> vector<2x32xf32>
    %202 = vector.shape_cast %201 : vector<2x32xf32> to vector<2x1x32xf32>
    %203 = vector.broadcast %202 : vector<2x1x32xf32> to vector<2x8x32xf32>
    %204 = arith.addf %1, %203 : vector<2x8x32xf32>
    %205 = math.tanh %204 : vector<2x8x32xf32>
    %206 = vector.broadcast %4 : vector<1x1x32xf32> to vector<2x8x32xf32>
    %207 = arith.mulf %205, %206 : vector<2x8x32xf32>
    %cst_62 = arith.constant dense<0.000000e+00> : vector<2x8xf32>
    %208 = vector.multi_reduction <add>, %207, %cst_62 [2] : vector<2x8x32xf32> to vector<2x8xf32>
    %cst_63 = arith.constant dense<0xFF800000> : vector<2xf32>
    %209 = vector.multi_reduction <maximumf>, %208, %cst_63 [1] : vector<2x8xf32> to vector<2xf32>
    %210 = vector.shape_cast %209 : vector<2xf32> to vector<2x1xf32>
    %211 = vector.broadcast %210 : vector<2x1xf32> to vector<2x8xf32>
    %212 = arith.subf %208, %211 : vector<2x8xf32>
    %213 = math.exp %212 : vector<2x8xf32>
    %cst_64 = arith.constant dense<0.000000e+00> : vector<2xf32>
    %214 = vector.multi_reduction <add>, %213, %cst_64 [1] : vector<2x8xf32> to vector<2xf32>
    %215 = vector.shape_cast %214 : vector<2xf32> to vector<2x1xf32>
    %216 = tpu.reciprocal %215 {approx = true} : vector<2x1xf32> -> vector<2x1xf32>
    %217 = arith.mulf %215, %216 : vector<2x1xf32>
    %cst_65 = arith.constant 2.000000e+00 : f32
    %218 = vector.broadcast %cst_65 : f32 to vector<2x1xf32>
    %219 = arith.subf %218, %217 : vector<2x1xf32>
    %220 = arith.mulf %216, %219 : vector<2x1xf32>
    %221 = vector.broadcast %220 : vector<2x1xf32> to vector<2x8xf32>
    %222 = arith.mulf %213, %221 : vector<2x8xf32>
    %223 = vector.shape_cast %222 : vector<2x8xf32> to vector<2x8x1xf32>
    %224 = vector.broadcast %223 : vector<2x8x1xf32> to vector<2x8x32xf32>
    %225 = arith.mulf %224, %0 : vector<2x8x32xf32>
    %cst_66 = arith.constant dense<0.000000e+00> : vector<2x32xf32>
    %226 = vector.multi_reduction <add>, %225, %cst_66 [1] : vector<2x8x32xf32> to vector<2x32xf32>
    %227 = arith.index_cast %c3_i32 : i32 to index
    %c0_67 = arith.constant 0 : index
    %c0_68 = arith.constant 0 : index
    %228 = vector.load %arg3[%227, %c0_67, %c0_68] : memref<4x2x96xf32, #tpu.memory_space<vmem>>, vector<1x2x96xf32>
    %229 = vector.shape_cast %228 : vector<1x2x96xf32> to vector<2x96xf32>
    %cst_69 = arith.constant dense<0.000000e+00> : vector<2x96xf32>
    %230 = tpu.matmul %226, %5, %cst_69 {dimension_numbers = #tpu.dot_dimension_numbers<[1], [0], [0], [1], [0, 0, 1, 1], [], []>} : vector<2x32xf32>, vector<32x96xf32>, vector<2x96xf32> -> vector<2x96xf32>
    %231 = arith.addf %229, %230 : vector<2x96xf32>
    %cst_70 = arith.constant dense<0.000000e+00> : vector<2x96xf32>
    %232 = tpu.matmul %196, %6, %cst_70 {dimension_numbers = #tpu.dot_dimension_numbers<[1], [0], [0], [1], [0, 0, 1, 1], [], []>} : vector<2x32xf32>, vector<32x96xf32>, vector<2x96xf32> -> vector<2x96xf32>
    %233 = vector.broadcast %7 : vector<1x96xf32> to vector<2x96xf32>
    %234 = arith.addf %232, %233 : vector<2x96xf32>
    %235 = vector.extract_strided_slice %231 {offsets = [0, 0], sizes = [2, 32], strides = [1, 1]} : vector<2x96xf32> to vector<2x32xf32>
    %236 = vector.extract_strided_slice %234 {offsets = [0, 0], sizes = [2, 32], strides = [1, 1]} : vector<2x96xf32> to vector<2x32xf32>
    %237 = arith.addf %235, %236 : vector<2x32xf32>
    %238 = arith.negf %237 : vector<2x32xf32>
    %239 = math.exp %238 : vector<2x32xf32>
    %cst_71 = arith.constant 1.000000e+00 : f32
    %240 = vector.broadcast %cst_71 : f32 to vector<2x32xf32>
    %241 = arith.addf %240, %239 : vector<2x32xf32>
    %242 = arith.divf %240, %241 : vector<2x32xf32>
    %243 = vector.extract_strided_slice %231 {offsets = [0, 32], sizes = [2, 32], strides = [1, 1]} : vector<2x96xf32> to vector<2x32xf32>
    %244 = vector.extract_strided_slice %234 {offsets = [0, 32], sizes = [2, 32], strides = [1, 1]} : vector<2x96xf32> to vector<2x32xf32>
    %245 = arith.addf %243, %244 : vector<2x32xf32>
    %246 = arith.negf %245 : vector<2x32xf32>
    %247 = math.exp %246 : vector<2x32xf32>
    %cst_72 = arith.constant 1.000000e+00 : f32
    %248 = vector.broadcast %cst_72 : f32 to vector<2x32xf32>
    %249 = arith.addf %248, %247 : vector<2x32xf32>
    %250 = arith.divf %248, %249 : vector<2x32xf32>
    %251 = vector.extract_strided_slice %231 {offsets = [0, 64], sizes = [2, 32], strides = [1, 1]} : vector<2x96xf32> to vector<2x32xf32>
    %252 = vector.extract_strided_slice %234 {offsets = [0, 64], sizes = [2, 32], strides = [1, 1]} : vector<2x96xf32> to vector<2x32xf32>
    %253 = arith.mulf %242, %252 : vector<2x32xf32>
    %254 = arith.addf %251, %253 : vector<2x32xf32>
    %255 = math.tanh %254 : vector<2x32xf32>
    %cst_73 = arith.constant 1.000000e+00 : f32
    %256 = vector.broadcast %cst_73 : f32 to vector<2x32xf32>
    %257 = arith.subf %256, %250 : vector<2x32xf32>
    %258 = arith.mulf %257, %255 : vector<2x32xf32>
    %259 = arith.mulf %250, %196 : vector<2x32xf32>
    %260 = arith.addf %258, %259 : vector<2x32xf32>
    %261 = arith.index_cast %c3_i32 : i32 to index
    %c0_74 = arith.constant 0 : index
    %c0_75 = arith.constant 0 : index
    %262 = vector.load %arg10[%261, %c0_74, %c0_75] : memref<4x2x32xf32, #tpu.memory_space<vmem>>, vector<1x2x32xf32>
    %263 = vector.shape_cast %262 : vector<1x2x32xf32> to vector<2x32xf32>
    %264 = vector.shape_cast %260 : vector<2x32xf32> to vector<1x2x32xf32>
    tpu.vector_store %arg10[%261, %c0_74, %c0_75], %264 {strides = array<i32>} : memref<4x2x32xf32, #tpu.memory_space<vmem>>, vector<1x2x32xf32>,
    %c4_i32 = arith.constant 4 : i32
    return
  }
  func.func @transform_0(%arg0: i32) -> (i32, i32, i32) {
    %c0_i32 = arith.constant 0 : i32
    %c0_i32_0 = arith.constant 0 : i32
    %c0_i32_1 = arith.constant 0 : i32
    %c0_i32_2 = arith.constant 0 : i32
    return %c0_i32, %c0_i32_0, %c0_i32_1 : i32, i32, i32
  }
  func.func @transform_1(%arg0: i32) -> (i32, i32, i32) {
    %c0_i32 = arith.constant 0 : i32
    %c0_i32_0 = arith.constant 0 : i32
    %c0_i32_1 = arith.constant 0 : i32
    %c0_i32_2 = arith.constant 0 : i32
    return %c0_i32, %c0_i32_0, %c0_i32_1 : i32, i32, i32
  }
  func.func @transform_2(%arg0: i32) -> (i32, i32, i32) {
    %c0_i32 = arith.constant 0 : i32
    %c0_i32_0 = arith.constant 0 : i32
    %c0_i32_1 = arith.constant 0 : i32
    %c0_i32_2 = arith.constant 0 : i32
    return %c0_i32, %c0_i32_0, %c0_i32_1 : i32, i32, i32
  }
  func.func @transform_3(%arg0: i32) -> (i32, i32) {
    %c0_i32 = arith.constant 0 : i32
    %c0_i32_0 = arith.constant 0 : i32
    %c0_i32_1 = arith.constant 0 : i32
    return %c0_i32, %c0_i32_0 : i32, i32
  }
  func.func @transform_4(%arg0: i32) -> (i32, i32) {
    %c0_i32 = arith.constant 0 : i32
    %c0_i32_0 = arith.constant 0 : i32
    %c0_i32_1 = arith.constant 0 : i32
    return %c0_i32, %c0_i32_0 : i32, i32
  }
  func.func @transform_5(%arg0: i32) -> (i32, i32) {
    %c0_i32 = arith.constant 0 : i32
    %c0_i32_0 = arith.constant 0 : i32
    %c0_i32_1 = arith.constant 0 : i32
    return %c0_i32, %c0_i32_0 : i32, i32
  }
  func.func @transform_6(%arg0: i32) -> (i32, i32) {
    %c0_i32 = arith.constant 0 : i32
    %c0_i32_0 = arith.constant 0 : i32
    %c0_i32_1 = arith.constant 0 : i32
    return %c0_i32, %c0_i32_0 : i32, i32
  }
  func.func @transform_7(%arg0: i32) -> (i32, i32) {
    %c0_i32 = arith.constant 0 : i32
    %c0_i32_0 = arith.constant 0 : i32
    %c0_i32_1 = arith.constant 0 : i32
    return %c0_i32, %c0_i32_0 : i32, i32
  }
  func.func @transform_8(%arg0: i32) -> (i32, i32) {
    %c0_i32 = arith.constant 0 : i32
    %c0_i32_0 = arith.constant 0 : i32
    %c0_i32_1 = arith.constant 0 : i32
    return %c0_i32, %c0_i32_0 : i32, i32
  }
  func.func @transform_9(%arg0: i32) -> (i32, i32, i32) {
    %c0_i32 = arith.constant 0 : i32
    %c0_i32_0 = arith.constant 0 : i32
    %c0_i32_1 = arith.constant 0 : i32
    %c0_i32_2 = arith.constant 0 : i32
    return %c0_i32, %c0_i32_0, %c0_i32_1 : i32, i32, i32
  }
}

</mosaic_0001>

<bundles_post_ra>
// kernel: decoder_rnn_forward.3
= control target key start
LH: loop header
LB: loop body
LE: loop exit
PB: predicated region body
PF: predicated region fallthrough
CT: control target
= control target key end

     0   :  { %v147_v0 = vmov 0.0|0.0   ;;  %vm148_vm0 = vmmov 0   ;;  %v149_v4 = vmov 0.0   ;;  %vm26_vm1 = vcmask 261120   ;;  %s191_s1 = inlined_call_operand.vmem [shape: f32[32,128], index: 1, kind: input, shape index: {}]   ;;  %s192_s0 = inlined_call_operand.vmem [shape: f32[8,32], index: 0, kind: input, shape index: {}]   ;;  %s193_s2 = inlined_call_operand.vmem [shape: f32[1,128], index: 2, kind: input, shape index: {}]   ;;  %s194_s3 = inlined_call_operand.vmem [shape: f32[8,128], index: 3, kind: output, shape index: {}]  }
   0x1   :  { %134 = vmatprep.subr.bf16.mxu0 %v147_v0  ;;  %v15_v1 = vld [vmem:[%s191_s1] sm:$0xff]  ;;  %v16_v2 = vld [vmem:[%s191_s1 + $0x8] sm:$0xff]  ;;  %v17_v3 = vld [vmem:[%s191_s1 + $0x10] sm:$0xff]  ;;  %131 = vmatprep.mubr.msk.f32.mxu0 %vm148_vm0, %v149_v4 }
   0x2   :  { %v135_v5 = vpack.c.bf16 %v16_v2, %v15_v1  ;;  %v18_v6 = vld [vmem:[%s191_s1 + $0x18] sm:$0xff]  ;;  %v14_v8 = vld [vmem:[%s192_s0] sm:$0xff] }
   0x3   :  { %v138_v7 = vpack.c.bf16 %v18_v6, %v17_v3  ;;  %v116_v9 = vld [vmem:[%s193_s2] ss:$0 sm:$0xff] }
   0x4   :  { %136 = vmatpush3.bf16.msra.mxu0 %v135_v5 }
   0x5   :  { %137 = vmatprep.subr.bf16.mxu0 %v147_v0 }
   0x8   :  { %139 = vmatpush3.bf16.msra.mxu0 %v138_v7 }
   0xb   :  { %132 = vmatmul.mubr.msk.f32.vlgmr.msra.gmra.mrb[0].mxu0 %vm26_vm1, %v14_v8 }
  0xde   :  { %v96_v10 = vpop.f32.mrb[0].mxu0 }
  0xdf   :  { %v97_v11 = vadd.f32 %v116_v9, %v96_v10  ;;  %v133_v12 = vpop.f32.mrb[1].mxu0 }
  0xe1   :  { %100 = vmax.xlane.f32.xlu0 %v97_v11 }
 0x16e   :  { %v101_v13 = vpop.xlane.xlu0 %100 }
 0x16f   :  { %v102_v14 = vsub.f32 %v97_v11, %v101_v13 }
 0x171   :  { %v103_v15 = vmul.f32 1.442695, %v102_v14 }
 0x173   :  { %143 = vpow2.f32 %v103_v15 }
 0x17d   :  { %v144_v16 = vpop.eup %143 }
 0x17e   :  { %105 = vadd.xlane.f32.xlu0 %v144_v16 }
 0x20b   :  { %v106_v17 = vpop.xlane.xlu0 %105 }
 0x20c   :  { %145 = vlog2.f32 %v106_v17 }
 0x216   :  { %v146_v18 = vpop.eup %145 }
 0x217   :  { %v108_v19 = vmul.f32 0.6931472, %v146_v18 }
 0x219   :  { %v109_v20 = vadd.f32 %v108_v19, %v101_v13 }
 0x21b   :  { %v110_v21 = vsub.f32 %v97_v11, %v109_v20 }
 0x21d   :  { %111 = vst [vmem:[%s194_s3] sm:$0xff] %v110_v21 }

// kernel: decoder_rnn_forward.2
= control target key start
LH: loop header
LB: loop body
LE: loop exit
PB: predicated region body
PF: predicated region fallthrough
CT: control target
= control target key end

     0   :  { %v2009_v0 = vmov 0.0|0.0   ;;  %vm2010_vm0 = vmmov 0   ;;  %v2011_v4 = vmov 0.0   ;;  %vm51_vm1 = vcmask 261120   ;;  %s2015_s19 = smov 96   ;;  %s2016_s20 = smov 32   ;;  %s2417_s4 = inlined_call_operand.vmem [shape: f32[32,32], index: 4, kind: input, shape index: {}]   ;;  %s2418_s3 = inlined_call_operand.vmem [shape: f32[2,32], index: 3, kind: input, shape index: {}]   ;;  %s2419_s0 = inlined_call_operand.vmem [shape: f32[2,8,32], index: 0, kind: input, shape index: {}]   ;;  %s2420_s5 = inlined_call_operand.vmem [shape: f32[1,32], index: 5, kind: input, shape index: {}]   ;;  %s2421_s7 = inlined_call_operand.vmem [shape: f32[32,96], index: 7, kind: input, shape index: {}]   ;;  %s2422_s6 = inlined_call_operand.vmem [shape: f32[32,96], index: 6, kind: input, shape index: {}]   ;;  %s2423_s8 = inlined_call_operand.vmem [shape: f32[1,96], index: 8, kind: input, shape index: {}]   ;;  %s2424_s1 = inlined_call_operand.vmem [shape: f32[2,8,32], index: 1, kind: input, shape index: {}]   ;;  %s2425_s2 = inlined_call_operand.vmem [shape: f32[4,2,96], index: 2, kind: input, shape index: {}]   ;;  %s2426_s9 = inlined_call_operand.vmem [shape: f32[4,2,32], index: 9, kind: output, shape index: {}]  }
   0x1   :  { %1863 = vmatprep.subr.bf16.mxu0 %v2009_v0  ;;  %v36_v1 = vld [vmem:[%s2417_s4] sm:$0xff]  ;;  %v37_v2 = vld [vmem:[%s2417_s4 + $0x8] sm:$0xff]  ;;  %v38_v3 = vld [vmem:[%s2417_s4 + $0x10] sm:$0xff]  ;;  %1739 = vmatprep.mubr.msk.f32.mxu0 %vm2010_vm0, %v2011_v4  ;;  %v2012_v9 = vmov 1966171168   ;;  %v129_v11 = vlaneseq  ;;  %vm188_vm2 = vcmask 1041409  }
   0x2   :  { %v2079_v5 = vpack.c.bf16 %v37_v2, %v36_v1  ;;  %v39_v6 = vld [vmem:[%s2417_s4 + $0x18] sm:$0xff]  ;;  %1869 = vmatprep.subr.bf16.mxu1 %v2009_v0  ;;  %1750 = vmatprep.mubr.msk.f32.mxu1 %vm2010_vm0, %v2011_v4  ;;  %v2095_v8 = vld [vmem:[%s2418_s3] sm:$0x3]  ;;  %v127_v10 = vunpack.c.l.s4 %v2012_v9  ;;  %v2118_v24 = vld [vmem:[%s2419_s0 + $0x8] sm:$0xff]  ;;  %vm191_vm3 = vcmask 58368   ;;  %v2013_v43 = vmov 0  }
   0x3   :  { %v2088_v7 = vpack.c.bf16 %v39_v6, %v38_v3  ;;  %v130_v13 = vshrl.u32 %v129_v11, 7  ;;  %v2111_v21 = vld [vmem:[%s2419_s0] sm:$0xff]  ;;  %v179_v35 = vand.u32 127, %v129_v11  ;;  %1944 = vset.pattern.permute.xlu0 %v2013_v43  ;;  %1943 = vset.pattern.permute.xlu1 %v2013_v43  ;;  %v46_v61 = vld [vmem:[%s2421_s7 + $0x8] sm:$0xff]  ;;  %v47_v62 = vld [vmem:[%s2421_s7 + $0x10] sm:$0xff]  ;;  %vm462_vm4 = vcmask 254976  }
   0x4   :  { %1865 = vmatpush3.bf16.msra.mxu0 %v2079_v5  ;;  %v128_v12 = vunpack.c.0.s8 %v127_v10  ;;  %v2126_v28 = vld [vmem:[%s2420_s5] ss:$0 sm:$0xff]  ;;  %v48_v1 = vld [vmem:[%s2421_s7 + $0x18] sm:$0xff] }
   0x5   :  { %1866 = vmatprep.subr.bf16.mxu0 %v2009_v0  ;;  %v2105_v17 = vsub.s32 0, %v130_v13  ;;  %v2132_v37 = vsub.s32 %v179_v35, %v130_v13  ;;  %v2138_v44 = vsub.s32 1, %v130_v13  ;;  %v45_v60 = vld [vmem:[%s2421_s7] sm:$0xff]  ;;  %v2161_v2 = vpack.c.bf16 %v48_v1, %v47_v62 }
   0x6   :  { %v2102_v14 = vsub.s32 %v128_v12, %v130_v13  ;;  %v2155_v63 = vpack.c.bf16 %v46_v61, %v45_v60 }
   0x8   :  { %1868 = vmatpush3.bf16.msra.mxu0 %v2088_v7 }
   0x9   :  { %1875 = vmatprep.subr.bf16.mxu0 %v2009_v0 }
   0xb   :  { %1740 = vmatmul.mubr.msk.f32.vlgmr.msra.gmra.mrb[0].mxu0 %vm51_vm1, %v2095_v8 }
   0xc   :  { %1761 = vmatprep.mubr.msk.f32.mxu0 %vm2010_vm0, %v2011_v4  ;;  %1877 = vmatpush3.bf16.msra.mxu0 %v2155_v63 }
   0xd   :  { %1878 = vmatprep.subr.bf16.mxu0 %v2009_v0 }
  0x10   :  { %1880 = vmatpush3.bf16.msra.mxu0 %v2161_v2 }
  0x11   :  { %1887 = vmatprep.subr.bf16.mxu0 %v2009_v0 }
  0x13   :  { %1762 = vmatmul.mubr.msk.f32.vlgmr.msra.gmra.mrb[2].mxu0 %vm51_vm1, %v2095_v8 }
  0x14   :  { %1783 = vmatprep.mubr.msk.f32.mxu0 %vm2010_vm0, %v2011_v4 }
  0xde   :  { %v121_v15 = vpop.f32.mrb[0].mxu0 }
  0xdf   :  { %v132_v16 = vrot.slane %v121_v15, %v2102_v14  ;;  %v1741_v18 = vpop.f32.mrb[1].mxu0 }
  0xe0   :  { %v41_v18 = vld [vmem:[%s2422_s6] sm:$0xff] }
  0xe1   :  { %v133_v19 = vcombine.high %v132_v16, %v132_v16  ;;  %v140_v20 = vrot.slane %v132_v16, %v2102_v14 }
  0xe3   :  { %v147_v22 = vrot.slane %v133_v19, %v2102_v14  ;;  %v151_v23 = vrot.slane %v140_v20, %v2105_v17  ;;  %v42_v19 = vld [vmem:[%s2422_s6 + $0x8] sm:$0xff] }
  0xe4   :  { %v2178_v20 = vpack.c.bf16 %v42_v19, %v41_v18 }
  0xe5   :  { %v155_v25 = vrot.slane %v147_v22, %v2105_v17  ;;  %v158_v26 = vadd.f32 %v151_v23, %v2111_v21  ;;  %v43_v22 = vld [vmem:[%s2422_s6 + $0x10] sm:$0xff]  ;;  %v44_v23 = vld [vmem:[%s2422_s6 + $0x18] sm:$0xff]  ;;  %s2014_s6 = smov 64  }
  0xe6   :  { %1871 = vmatpush3.bf16.msra.mxu1 %v2178_v20  ;;  %1889 = vmatpush3.bf16.msra.mxu0 %v2178_v20 }
  0xe7   :  { %v159_v27 = vadd.f32 %v155_v25, %v2118_v24  ;;  %1945 = vtanh.f32 %v158_v26  ;;  %1872 = vmatprep.subr.bf16.mxu1 %v2009_v0  ;;  %1890 = vmatprep.subr.bf16.mxu0 %v2009_v0  ;;  %v2190_v25 = vpack.c.bf16 %v44_v23, %v43_v22  ;;  %v2199_v26 = vld [vmem:[%s2423_s8] ss:$0 sm:$0xff] }
  0xe9   :  { %1947 = vtanh.f32 %v159_v27  ;;  %v425_v27 = vpop.f32.mrb[2].mxu0 }
  0xea   :  { %1874 = vmatpush3.bf16.msra.mxu1 %v2190_v25  ;;  %1892 = vmatpush3.bf16.msra.mxu0 %v2190_v25 }
  0xeb   :  { %1881 = vmatprep.subr.bf16.mxu1 %v2009_v0  ;;  %1899 = vmatprep.subr.bf16.mxu0 %v2009_v0 }
  0xf1   :  { %v1946_v29 = vpop.eup %1945 }
  0xf2   :  { %v168_v30 = vmul.f32 %v1946_v29, %v2126_v28  ;;  %v426_v29 = vadd.f32 %v2199_v26, %v425_v27 }
  0xf3   :  { %v1948_v31 = vpop.eup %1947 }
  0xf4   :  { %v170_v32 = vsel %vm51_vm1, %v168_v30, 0.0  ;;  %v169_v33 = vmul.f32 %v1948_v31, %v2126_v28  ;;  %v1763_v30 = vpop.f32.mrb[3].mxu0  ;;  %v2206_v31 = vld [vmem:[%s2424_s1] sm:$0xff] }
  0xf5   :  { %171 = vadd.xlane.f32.xlu0 %v170_v32 }
  0xf6   :  { %v173_v34 = vsel %vm51_vm1, %v169_v33, 0.0 }
  0xf9   :  { %174 = vadd.xlane.f32.xlu0 %v173_v34  ;;  %v2212_v34 = vld [vmem:[%s2424_s1 + $0x8] sm:$0xff] }
 0x182   :  { %v172_v36 = vpop.xlane.xlu0 %171 }
 0x183   :  { %v183_v39 = vrot.slane %v172_v36, %v2132_v37 }
 0x186   :  { %v175_v38 = vpop.xlane.xlu0 %174 }
 0x187   :  { %v187_v40 = vrot.slane %v175_v38, %v2132_v37 }
 0x189   :  { %v189_v41 = vsel %vm188_vm2, %v187_v40, %v183_v39 }
 0x18a   :  { %v192_v42 = vsel %vm191_vm3, %v189_v41, -inf }
 0x18b   :  { %193 = vmax.xlane.f32.xlu1 %v192_v42 }
 0x218   :  { %v194_v45 = vpop.xlane.xlu1 %193 }
 0x219   :  { %v199_v46 = vrot.slane %v194_v45, %v2105_v17  ;;  %v203_v47 = vrot.slane %v194_v45, %v2138_v44 }
 0x21b   :  { %v206_v48 = vsub.f32 %v172_v36, %v199_v46  ;;  %v207_v49 = vsub.f32 %v175_v38, %v203_v47 }
 0x21d   :  { %v208_v50 = vmul.f32 1.442695, %v206_v48  ;;  %v210_v51 = vmul.f32 1.442695, %v207_v49 }
 0x21f   :  { %1949 = vpow2.f32 %v208_v50 }
 0x220   :  { %1951 = vpow2.f32 %v210_v51 }
 0x229   :  { %v1950_v52 = vpop.eup %1949 }
 0x22a   :  { %v1952_v53 = vpop.eup %1951  ;;  %215 = vperm.xlu1 %1943, %v1950_v52  }
 0x22b   :  { %218 = vperm.xlu0 %1944, %v1952_v53  }
 0x2a9   :  { %v216_v54 = vpop.permute.xlu1 %215 }
 0x2aa   :  { %v219_v55 = vpop.permute.xlu0 %218  ;;  %v223_v56 = vrot.slane %v216_v54, %v2132_v37  ;;  %v276_v54 = vld [vmem:[%s2425_s2] sm:$0x3] }
 0x2ab   :  { %v227_v57 = vrot.slane %v219_v55, %v2132_v37 }
 0x2ad   :  { %v228_v58 = vsel %vm188_vm2, %v227_v57, %v223_v56 }
 0x2ae   :  { %v230_v59 = vsel %vm191_vm3, %v228_v58, 0.0 }
 0x2af   :  { %231 = vadd.xlane.f32.xlu1 %v230_v59 }
 0x2c0   :  { %437 = vrot.lane.b32.xlu1 %v426_v29, %s2014_s6 }
 0x33c   :  { %v232_v3 = vpop.xlane.xlu1 %231 }
 0x33d   :  { %1953 = vrcp.f32 %v232_v3 }
 0x340   :  { %v438_v62 = vpop.permute.xlu1 %437 }
 0x347   :  { %v1954_v6 = vpop.eup %1953 }
 0x348   :  { %v234_v9 = vmul.f32 %v1954_v6, %v232_v3 }
 0x34a   :  { %v235_v10 = vsub.f32 2.0, %v234_v9 }
 0x34c   :  { %v236_v11 = vmul.f32 %v1954_v6, %v235_v10 }
 0x34e   :  { %v241_v12 = vrot.slane %v236_v11, %v2105_v17  ;;  %v245_v15 = vrot.slane %v236_v11, %v2138_v44 }
 0x350   :  { %v248_v13 = vmul.f32 %v1950_v52, %v241_v12  ;;  %v249_v16 = vmul.f32 %v1952_v53, %v245_v15 }
 0x352   :  { %252 = vperm.xlu0 %1944, %v248_v13  }
 0x356   :  { %257 = vperm.xlu0 %1944, %v249_v16  }
 0x3d1   :  { %v253_v32 = vpop.permute.xlu0 %252 }
 0x3d2   :  { %v260_v33 = vmul.f32 %v253_v32, %v2206_v31 }
 0x3d4   :  { %v262_v35 = vsel %vm51_vm1, %v260_v33, 0.0 }
 0x3d5   :  { %v263_v36 = vrot.slane %v262_v35, 4  ;;  %v258_v38 = vpop.permute.xlu0 %257 }
 0x3d6   :  { %v261_v39 = vmul.f32 %v258_v38, %v2212_v34 }
 0x3d7   :  { %v264_v40 = vadd.f32 %v263_v36, %v262_v35 }
 0x3d8   :  { %v269_v41 = vsel %vm51_vm1, %v261_v39, 0.0 }
 0x3d9   :  { %v265_v42 = vrot.slane %v264_v40, 2  ;;  %v270_v43 = vrot.slane %v269_v41, 4 }
 0x3db   :  { %v266_v45 = vadd.f32 %v265_v42, %v264_v40  ;;  %v271_v46 = vadd.f32 %v270_v43, %v269_v41 }
 0x3dd   :  { %v272_v47 = vrot.slane %v271_v46, 2  ;;  %v267_v48 = vrot.slane %v266_v45, 1 }
 0x3df   :  { %v273_v49 = vadd.f32 %v272_v47, %v271_v46  ;;  %v268_v51 = vadd.f32 %v267_v48, %v266_v45 }
 0x3e1   :  { %v274_v50 = vrot.slane %v273_v49, 1 }
 0x3e3   :  { %v275_v52 = vadd.f32 %v274_v50, %v273_v49 }
 0x3e5   :  { %v279_v53 = vsel %vm188_vm2, %v275_v52, %v268_v51 }
 0x3e6   :  { %1751 = vmatmul.mubr.msk.f32.vlgmr.msra.gmra.mrb[0].mxu1 %vm51_vm1, %v279_v53 }
 0x3e7   :  { %1883 = vmatpush3.bf16.msra.mxu1 %v2079_v5  ;;  %1772 = vmatprep.mubr.msk.f32.mxu1 %vm2010_vm0, %v2011_v4 }
 0x3e8   :  { %1884 = vmatprep.subr.bf16.mxu1 %v2009_v0 }
 0x3eb   :  { %1886 = vmatpush3.bf16.msra.mxu1 %v2088_v7 }
 0x3ec   :  { %1893 = vmatprep.subr.bf16.mxu1 %v2009_v0 }
 0x4b9   :  { %v348_v55 = vpop.f32.mrb[0].mxu1 }
 0x4ba   :  { %v352_v56 = vadd.f32 %v348_v55, %v276_v54  ;;  %v1752_v57 = vpop.f32.mrb[1].mxu1 }
 0x4bc   :  { %v429_v58 = vadd.f32 %v426_v29, %v352_v56 }
 0x4be   :  { %v1652_v59 = vmul.f32 -1.442695, %v429_v58 }
 0x4c0   :  { %1955 = vpow2.f32 %v1652_v59 }
 0x4ca   :  { %v1956_v60 = vpop.eup %1955 }
 0x4cb   :  { %v433_v61 = vadd.f32 1.0, %v1956_v60 }
 0x4cd   :  { %1957 = vrcp.f32 %v433_v61 }
 0x4d7   :  { %v1958_v1 = vpop.eup %1957 }
 0x4d8   :  { %v440_v3 = vmul.f32 %v1958_v1, %v438_v62  ;;  %v447_v12 = vsub.f32 1.0, %v1958_v1 }
 0x4da   :  { %442 = vrot.lane.b32.xlu0 %v440_v3, %s2014_s6 }
 0x54c   :  { %v443_v6 = vpop.permute.xlu0 %442 }
 0x54d   :  { %v445_v9 = vadd.f32 %v443_v6, %v352_v56 }
 0x54f   :  { %1959 = vtanh.f32 %v445_v9 }
 0x559   :  { %v1960_v10 = vpop.eup %1959 }
 0x55a   :  { %449 = vrot.lane.b32.xlu0 %v1960_v10, %s2015_s19 }
 0x55e   :  { %453 = vrot.lane.b32.xlu0 %v2095_v8, %s2016_s20 }
 0x5cc   :  { %v450_v11 = vpop.permute.xlu0 %449 }
 0x5cd   :  { %v452_v15 = vmul.f32 %v450_v11, %v447_v12 }
 0x5d0   :  { %v454_v13 = vpop.permute.xlu0 %453 }
 0x5d1   :  { %v456_v16 = vmul.f32 %v1958_v1, %v454_v13 }
 0x5d3   :  { %v2231_v18 = vadd.f32 %v456_v16, %v452_v15 }
 0x5d5   :  { %459 = vrot.lane.b32.xlu0 %v2231_v18, %s2015_s19 }
 0x647   :  { %v460_v19 = vpop.permute.xlu0 %459 }
 0x648   :  { %463 = vst.msk [vmem:[%s2426_s9] sm:$0x3] %vm462_vm4, %v460_v19  ;;  %1773 = vmatmul.mubr.msk.f32.vlgmr.msra.gmra.mrb[2].mxu1 %vm51_vm1, %v460_v19 }
 0x649   :  { %1895 = vmatpush3.bf16.msra.mxu1 %v2155_v63  ;;  %1794 = vmatprep.mubr.msk.f32.mxu1 %vm2010_vm0, %v2011_v4 }
 0x64a   :  { %1896 = vmatprep.subr.bf16.mxu1 %v2009_v0 }
 0x64d   :  { %1898 = vmatpush3.bf16.msra.mxu1 %v2161_v2 }
 0x64e   :  { %1905 = vmatprep.subr.bf16.mxu1 %v2009_v0 }
 0x650   :  { %1795 = vmatmul.mubr.msk.f32.vlgmr.msra.gmra.mrb[4].mxu1 %vm51_vm1, %v460_v19 }
 0x651   :  { %1907 = vmatpush3.bf16.msra.mxu1 %v2178_v20  ;;  %1816 = vmatprep.mubr.msk.f32.mxu1 %vm2010_vm0, %v2011_v4 }
 0x652   :  { %1908 = vmatprep.subr.bf16.mxu1 %v2009_v0 }
 0x655   :  { %1910 = vmatpush3.bf16.msra.mxu1 %v2190_v25 }
 0x656   :  { %1917 = vmatprep.subr.bf16.mxu1 %v2009_v0 }
 0x71b   :  { %v532_v8 = vpop.f32.mrb[2].mxu1 }
 0x71c   :  { %v543_v22 = vrot.slane %v532_v8, %v2102_v14  ;;  %v1774_v23 = vpop.f32.mrb[3].mxu1 }
 0x71e   :  { %v544_v27 = vcombine.high %v543_v22, %v543_v22  ;;  %v551_v29 = vrot.slane %v543_v22, %v2102_v14 }
 0x720   :  { %v558_v30 = vrot.slane %v544_v27, %v2102_v14  ;;  %v562_v32 = vrot.slane %v551_v29, %v2105_v17 }
 0x722   :  { %v566_v33 = vrot.slane %v558_v30, %v2105_v17  ;;  %v569_v35 = vadd.f32 %v562_v32, %v2111_v21 }
 0x723   :  { %v821_v36 = vpop.f32.mrb[4].mxu1 }
 0x724   :  { %v570_v38 = vadd.f32 %v566_v33, %v2118_v24  ;;  %1961 = vtanh.f32 %v569_v35  ;;  %v1796_v39 = vpop.f32.mrb[5].mxu1  ;;  %v822_v27 = vadd.f32 %v2199_v26, %v821_v36 }
 0x726   :  { %1963 = vtanh.f32 %v570_v38 }
 0x72e   :  { %v1962_v40 = vpop.eup %1961 }
 0x72f   :  { %v573_v41 = vmul.f32 %v1962_v40, %v2126_v28 }
 0x730   :  { %v1964_v42 = vpop.eup %1963 }
 0x731   :  { %v575_v43 = vsel %vm51_vm1, %v573_v41, 0.0  ;;  %v574_v45 = vmul.f32 %v1964_v42, %v2126_v28 }
 0x732   :  { %576 = vadd.xlane.f32.xlu1 %v575_v43 }
 0x733   :  { %v578_v46 = vsel %vm51_vm1, %v574_v45, 0.0 }
 0x734   :  { %579 = vadd.xlane.f32.xlu0 %v578_v46 }
 0x7bf   :  { %v577_v47 = vpop.xlane.xlu1 %576 }
 0x7c0   :  { %v586_v49 = vrot.slane %v577_v47, %v2132_v37 }
 0x7c1   :  { %v580_v48 = vpop.xlane.xlu0 %579 }
 0x7c2   :  { %v590_v50 = vrot.slane %v580_v48, %v2132_v37 }
 0x7c4   :  { %v591_v51 = vsel %vm188_vm2, %v590_v50, %v586_v49 }
 0x7c5   :  { %v593_v52 = vsel %vm191_vm3, %v591_v51, -inf }
 0x7c6   :  { %594 = vmax.xlane.f32.xlu0 %v593_v52  ;;  %v1654_v52 = vld [vmem:[%s2425_s2 + $0x2] sm:$0x3] }
 0x853   :  { %v595_v53 = vpop.xlane.xlu0 %594 }
 0x854   :  { %v600_v54 = vrot.slane %v595_v53, %v2105_v17  ;;  %v604_v55 = vrot.slane %v595_v53, %v2138_v44 }
 0x856   :  { %v607_v56 = vsub.f32 %v577_v47, %v600_v54  ;;  %v608_v57 = vsub.f32 %v580_v48, %v604_v55 }
 0x858   :  { %v609_v58 = vmul.f32 1.442695, %v607_v56  ;;  %v611_v59 = vmul.f32 1.442695, %v608_v57 }
 0x85a   :  { %1965 = vpow2.f32 %v609_v58 }
 0x85b   :  { %1967 = vpow2.f32 %v611_v59 }
 0x864   :  { %v1966_v60 = vpop.eup %1965 }
 0x865   :  { %v1968_v61 = vpop.eup %1967  ;;  %616 = vperm.xlu1 %1943, %v1966_v60  }
 0x866   :  { %619 = vperm.xlu0 %1944, %v1968_v61  }
 0x8e4   :  { %v617_v62 = vpop.permute.xlu1 %616 }
 0x8e5   :  { %v620_v1 = vpop.permute.xlu0 %619  ;;  %v624_v3 = vrot.slane %v617_v62, %v2132_v37 }
 0x8e6   :  { %v628_v6 = vrot.slane %v620_v1, %v2132_v37 }
 0x8e8   :  { %v629_v9 = vsel %vm188_vm2, %v628_v6, %v624_v3 }
 0x8e9   :  { %v631_v10 = vsel %vm191_vm3, %v629_v9, 0.0 }
 0x8ea   :  { %632 = vadd.xlane.f32.xlu1 %v631_v10 }
 0x977   :  { %v633_v11 = vpop.xlane.xlu1 %632 }
 0x978   :  { %1969 = vrcp.f32 %v633_v11 }
 0x982   :  { %v1970_v12 = vpop.eup %1969 }
 0x983   :  { %v635_v13 = vmul.f32 %v1970_v12, %v633_v11 }
 0x985   :  { %v636_v15 = vsub.f32 2.0, %v635_v13 }
 0x987   :  { %v637_v16 = vmul.f32 %v1970_v12, %v636_v15 }
 0x989   :  { %v642_v19 = vrot.slane %v637_v16, %v2105_v17  ;;  %v646_v22 = vrot.slane %v637_v16, %v2138_v44 }
 0x98b   :  { %v649_v8 = vmul.f32 %v1966_v60, %v642_v19  ;;  %v650_v23 = vmul.f32 %v1968_v61, %v646_v22 }
 0x98d   :  { %653 = vperm.xlu0 %1944, %v649_v8  }
 0x991   :  { %658 = vperm.xlu0 %1944, %v650_v23  }
 0x995   :  { %833 = vrot.lane.b32.xlu0 %v822_v27, %s2014_s6 }
 0xa0c   :  { %v654_v29 = vpop.permute.xlu0 %653 }
 0xa0d   :  { %v661_v30 = vmul.f32 %v654_v29, %v2206_v31 }
 0xa0f   :  { %v663_v32 = vsel %vm51_vm1, %v661_v30, 0.0 }
 0xa10   :  { %v664_v33 = vrot.slane %v663_v32, 4  ;;  %v659_v35 = vpop.permute.xlu0 %658 }
 0xa11   :  { %v662_v38 = vmul.f32 %v659_v35, %v2212_v34 }
 0xa12   :  { %v665_v39 = vadd.f32 %v664_v33, %v663_v32 }
 0xa13   :  { %v670_v40 = vsel %vm51_vm1, %v662_v38, 0.0 }
 0xa14   :  { %v666_v41 = vrot.slane %v665_v39, 2  ;;  %v671_v42 = vrot.slane %v670_v40, 4  ;;  %v834_v61 = vpop.permute.xlu0 %833 }
 0xa16   :  { %v667_v43 = vadd.f32 %v666_v41, %v665_v39  ;;  %v672_v45 = vadd.f32 %v671_v42, %v670_v40 }
 0xa18   :  { %v673_v46 = vrot.slane %v672_v45, 2  ;;  %v668_v36 = vrot.slane %v667_v43, 1 }
 0xa1a   :  { %v674_v47 = vadd.f32 %v673_v46, %v672_v45  ;;  %v669_v49 = vadd.f32 %v668_v36, %v667_v43 }
 0xa1c   :  { %v675_v48 = vrot.slane %v674_v47, 1 }
 0xa1e   :  { %v676_v50 = vadd.f32 %v675_v48, %v674_v47 }
 0xa20   :  { %v681_v51 = vsel %vm188_vm2, %v676_v50, %v669_v49 }
 0xa21   :  { %1784 = vmatmul.mubr.msk.f32.vlgmr.msra.gmra.mrb[4].mxu0 %vm51_vm1, %v681_v51 }
 0xa22   :  { %1901 = vmatpush3.bf16.msra.mxu0 %v2079_v5  ;;  %1805 = vmatprep.mubr.msk.f32.mxu0 %vm2010_vm0, %v2011_v4 }
 0xa23   :  { %1902 = vmatprep.subr.bf16.mxu0 %v2009_v0 }
 0xa26   :  { %1904 = vmatpush3.bf16.msra.mxu0 %v2088_v7 }
 0xa27   :  { %1911 = vmatprep.subr.bf16.mxu0 %v2009_v0 }
 0xaf4   :  { %v750_v53 = vpop.f32.mrb[4].mxu0 }
 0xaf5   :  { %v754_v54 = vadd.f32 %v1654_v52, %v750_v53  ;;  %v1785_v55 = vpop.f32.mrb[5].mxu0 }
 0xaf7   :  { %v825_v56 = vadd.f32 %v822_v27, %v754_v54 }
 0xaf9   :  { %v1657_v57 = vmul.f32 -1.442695, %v825_v56 }
 0xafb   :  { %1971 = vpow2.f32 %v1657_v57 }
 0xb05   :  { %v1972_v58 = vpop.eup %1971 }
 0xb06   :  { %v829_v59 = vadd.f32 1.0, %v1972_v58 }
 0xb08   :  { %1973 = vrcp.f32 %v829_v59 }
 0xb12   :  { %v1974_v60 = vpop.eup %1973 }
 0xb13   :  { %v836_v62 = vmul.f32 %v1974_v60, %v834_v61  ;;  %v843_v9 = vsub.f32 1.0, %v1974_v60  ;;  %v849_v11 = vmul.f32 %v1974_v60, %v2231_v18 }
 0xb15   :  { %838 = vrot.lane.b32.xlu0 %v836_v62, %s2014_s6 }
 0xb87   :  { %v839_v1 = vpop.permute.xlu0 %838 }
 0xb88   :  { %v841_v3 = vadd.f32 %v839_v1, %v754_v54 }
 0xb8a   :  { %1975 = vtanh.f32 %v841_v3 }
 0xb94   :  { %v1976_v6 = vpop.eup %1975 }
 0xb95   :  { %845 = vrot.lane.b32.xlu0 %v1976_v6, %s2015_s19 }
 0xc07   :  { %v846_v10 = vpop.permute.xlu0 %845 }
 0xc08   :  { %v848_v12 = vmul.f32 %v846_v10, %v843_v9 }
 0xc0a   :  { %v2296_v13 = vadd.f32 %v849_v11, %v848_v12 }
 0xc0c   :  { %852 = vrot.lane.b32.xlu0 %v2296_v13, %s2015_s19 }
 0xc7e   :  { %v853_v15 = vpop.permute.xlu0 %852 }
 0xc7f   :  { %1658 = vst.msk [vmem:[%s2426_s9 + $0x2] sm:$0x3] %vm462_vm4, %v853_v15  ;;  %1806 = vmatmul.mubr.msk.f32.vlgmr.msra.gmra.mrb[6].mxu0 %vm51_vm1, %v853_v15 }
 0xc80   :  { %1913 = vmatpush3.bf16.msra.mxu0 %v2155_v63  ;;  %1827 = vmatprep.mubr.msk.f32.mxu0 %vm2010_vm0, %v2011_v4 }
 0xc81   :  { %1914 = vmatprep.subr.bf16.mxu0 %v2009_v0 }
 0xc84   :  { %1916 = vmatpush3.bf16.msra.mxu0 %v2161_v2 }
 0xc85   :  { %1923 = vmatprep.subr.bf16.mxu0 %v2009_v0 }
 0xc87   :  { %1828 = vmatmul.mubr.msk.f32.vlgmr.msra.gmra.mrb[8].mxu0 %vm51_vm1, %v853_v15 }
 0xc88   :  { %1925 = vmatpush3.bf16.msra.mxu0 %v2178_v20  ;;  %1849 = vmatprep.mubr.msk.f32.mxu0 %vm2010_vm0, %v2011_v4 }
 0xc89   :  { %1926 = vmatprep.subr.bf16.mxu0 %v2009_v0 }
 0xc8c   :  { %1928 = vmatpush3.bf16.msra.mxu0 %v2190_v25 }
 0xd52   :  { %v925_v18 = vpop.f32.mrb[6].mxu0 }
 0xd53   :  { %v936_v16 = vrot.slane %v925_v18, %v2102_v14  ;;  %v1807_v19 = vpop.f32.mrb[7].mxu0 }
 0xd55   :  { %v937_v8 = vcombine.high %v936_v16, %v936_v16  ;;  %v944_v22 = vrot.slane %v936_v16, %v2102_v14 }
 0xd57   :  { %v951_v23 = vrot.slane %v937_v8, %v2102_v14  ;;  %v955_v27 = vrot.slane %v944_v22, %v2105_v17 }
 0xd59   :  { %v959_v20 = vrot.slane %v951_v23, %v2105_v17  ;;  %v962_v29 = vadd.f32 %v955_v27, %v2111_v21 }
 0xd5a   :  { %v1214_v30 = vpop.f32.mrb[8].mxu0 }
 0xd5b   :  { %v963_v32 = vadd.f32 %v959_v20, %v2118_v24  ;;  %1977 = vtanh.f32 %v962_v29  ;;  %v1829_v25 = vpop.f32.mrb[9].mxu0  ;;  %v1215_v16 = vadd.f32 %v2199_v26, %v1214_v30 }
 0xd5d   :  { %1979 = vtanh.f32 %v963_v32 }
 0xd65   :  { %v1978_v33 = vpop.eup %1977 }
 0xd66   :  { %v966_v35 = vmul.f32 %v1978_v33, %v2126_v28 }
 0xd67   :  { %v1980_v38 = vpop.eup %1979 }
 0xd68   :  { %v968_v39 = vsel %vm51_vm1, %v966_v35, 0.0  ;;  %v967_v40 = vmul.f32 %v1980_v38, %v2126_v28 }
 0xd69   :  { %969 = vadd.xlane.f32.xlu0 %v968_v39 }
 0xd6a   :  { %v971_v41 = vsel %vm51_vm1, %v967_v40, 0.0 }
 0xd6b   :  { %972 = vadd.xlane.f32.xlu1 %v971_v41 }
 0xdf6   :  { %v970_v42 = vpop.xlane.xlu0 %969 }
 0xdf7   :  { %v979_v45 = vrot.slane %v970_v42, %v2132_v37 }
 0xdf8   :  { %v973_v43 = vpop.xlane.xlu1 %972 }
 0xdf9   :  { %v983_v46 = vrot.slane %v973_v43, %v2132_v37 }
 0xdfb   :  { %v984_v36 = vsel %vm188_vm2, %v983_v46, %v979_v45  ;;  %v1660_v46 = vld [vmem:[%s2425_s2 + $0x4] sm:$0x3] }
 0xdfc   :  { %v986_v47 = vsel %vm191_vm3, %v984_v36, -inf }
 0xdfd   :  { %987 = vmax.xlane.f32.xlu1 %v986_v47 }
 0xe8a   :  { %v988_v48 = vpop.xlane.xlu1 %987 }
 0xe8b   :  { %v993_v49 = vrot.slane %v988_v48, %v2105_v17  ;;  %v997_v50 = vrot.slane %v988_v48, %v2138_v44 }
 0xe8d   :  { %v1000_v51 = vsub.f32 %v970_v42, %v993_v49  ;;  %v1001_v52 = vsub.f32 %v973_v43, %v997_v50 }
 0xe8f   :  { %v1002_v53 = vmul.f32 1.442695, %v1000_v51  ;;  %v1004_v54 = vmul.f32 1.442695, %v1001_v52 }
 0xe91   :  { %1981 = vpow2.f32 %v1002_v53 }
 0xe92   :  { %1983 = vpow2.f32 %v1004_v54 }
 0xe9b   :  { %v1982_v55 = vpop.eup %1981 }
 0xe9c   :  { %v1984_v56 = vpop.eup %1983  ;;  %1009 = vperm.xlu1 %1943, %v1982_v55  }
 0xe9d   :  { %1012 = vperm.xlu0 %1944, %v1984_v56  }
 0xf1b   :  { %v1010_v57 = vpop.permute.xlu1 %1009 }
 0xf1c   :  { %v1013_v58 = vpop.permute.xlu0 %1012  ;;  %v1017_v59 = vrot.slane %v1010_v57, %v2132_v37 }
 0xf1d   :  { %v1021_v60 = vrot.slane %v1013_v58, %v2132_v37 }
 0xf1f   :  { %v1022_v61 = vsel %vm188_vm2, %v1021_v60, %v1017_v59 }
 0xf20   :  { %v1024_v62 = vsel %vm191_vm3, %v1022_v61, 0.0 }
 0xf21   :  { %1025 = vadd.xlane.f32.xlu1 %v1024_v62 }
 0xfae   :  { %v1026_v1 = vpop.xlane.xlu1 %1025 }
 0xfaf   :  { %1985 = vrcp.f32 %v1026_v1 }
 0xfb9   :  { %v1986_v3 = vpop.eup %1985 }
 0xfba   :  { %v1028_v6 = vmul.f32 %v1986_v3, %v1026_v1 }
 0xfbc   :  { %v1029_v9 = vsub.f32 2.0, %v1028_v6 }
 0xfbe   :  { %v1030_v10 = vmul.f32 %v1986_v3, %v1029_v9 }
 0xfc0   :  { %v1035_v11 = vrot.slane %v1030_v10, %v2105_v17  ;;  %v1039_v15 = vrot.slane %v1030_v10, %v2138_v44 }
 0xfc2   :  { %v1042_v12 = vmul.f32 %v1982_v55, %v1035_v11  ;;  %v1043_v18 = vmul.f32 %v1984_v56, %v1039_v15 }
 0xfc4   :  { %1046 = vperm.xlu0 %1944, %v1042_v12  }
 0xfc8   :  { %1051 = vperm.xlu0 %1944, %v1043_v18  }
 0xfcc   :  { %1226 = vrot.lane.b32.xlu0 %v1215_v16, %s2014_s6 }
0x1043   :  { %v1047_v19 = vpop.permute.xlu0 %1046 }
0x1044   :  { %v1054_v8 = vmul.f32 %v1047_v19, %v2206_v31 }
0x1046   :  { %v1056_v22 = vsel %vm51_vm1, %v1054_v8, 0.0 }
0x1047   :  { %v1057_v23 = vrot.slane %v1056_v22, 4  ;;  %v1052_v27 = vpop.permute.xlu0 %1051 }
0x1048   :  { %v1055_v20 = vmul.f32 %v1052_v27, %v2212_v34 }
0x1049   :  { %v1058_v29 = vadd.f32 %v1057_v23, %v1056_v22 }
0x104a   :  { %v1063_v32 = vsel %vm51_vm1, %v1055_v20, 0.0 }
0x104b   :  { %v1059_v25 = vrot.slane %v1058_v29, 2  ;;  %v1064_v33 = vrot.slane %v1063_v32, 4  ;;  %v1227_v53 = vpop.permute.xlu0 %1226 }
0x104d   :  { %v1060_v35 = vadd.f32 %v1059_v25, %v1058_v29  ;;  %v1065_v38 = vadd.f32 %v1064_v33, %v1063_v32 }
0x104f   :  { %v1066_v39 = vrot.slane %v1065_v38, 2  ;;  %v1061_v30 = vrot.slane %v1060_v35, 1 }
0x1051   :  { %v1067_v40 = vadd.f32 %v1066_v39, %v1065_v38  ;;  %v1062_v42 = vadd.f32 %v1061_v30, %v1060_v35 }
0x1053   :  { %v1068_v41 = vrot.slane %v1067_v40, 1 }
0x1055   :  { %v1069_v43 = vadd.f32 %v1068_v41, %v1067_v40 }
0x1057   :  { %v1074_v45 = vsel %vm188_vm2, %v1069_v43, %v1062_v42 }
0x1058   :  { %1817 = vmatmul.mubr.msk.f32.vlgmr.msra.gmra.mrb[6].mxu1 %vm51_vm1, %v1074_v45 }
0x1059   :  { %1919 = vmatpush3.bf16.msra.mxu1 %v2079_v5  ;;  %1838 = vmatprep.mubr.msk.f32.mxu1 %vm2010_vm0, %v2011_v4 }
0x105a   :  { %1920 = vmatprep.subr.bf16.mxu1 %v2009_v0 }
0x105d   :  { %1922 = vmatpush3.bf16.msra.mxu1 %v2088_v7 }
0x105e   :  { %1929 = vmatprep.subr.bf16.mxu1 %v2009_v0 }
0x112b   :  { %v1143_v36 = vpop.f32.mrb[6].mxu1 }
0x112c   :  { %v1147_v47 = vadd.f32 %v1660_v46, %v1143_v36  ;;  %v1818_v48 = vpop.f32.mrb[7].mxu1 }
0x112e   :  { %v1218_v49 = vadd.f32 %v1215_v16, %v1147_v47 }
0x1130   :  { %v1663_v50 = vmul.f32 -1.442695, %v1218_v49 }
0x1132   :  { %1987 = vpow2.f32 %v1663_v50 }
0x113c   :  { %v1988_v5 = vpop.eup %1987 }
0x113d   :  { %v1222_v51 = vadd.f32 1.0, %v1988_v5 }
0x113f   :  { %1989 = vrcp.f32 %v1222_v51 }
0x1149   :  { %v1990_v52 = vpop.eup %1989 }
0x114a   :  { %v1229_v54 = vmul.f32 %v1990_v52, %v1227_v53  ;;  %v1236_v57 = vsub.f32 1.0, %v1990_v52  ;;  %v1242_v59 = vmul.f32 %v1990_v52, %v2296_v13 }
0x114c   :  { %1231 = vrot.lane.b32.xlu0 %v1229_v54, %s2014_s6 }
0x11be   :  { %v1232_v7 = vpop.permute.xlu0 %1231 }
0x11bf   :  { %v1234_v55 = vadd.f32 %v1232_v7, %v1147_v47 }
0x11c1   :  { %1991 = vtanh.f32 %v1234_v55 }
0x11cb   :  { %v1992_v56 = vpop.eup %1991 }
0x11cc   :  { %1238 = vrot.lane.b32.xlu1 %v1992_v56, %s2015_s19 }
0x123e   :  { %v1239_v58 = vpop.permute.xlu1 %1238 }
0x123f   :  { %v1241_v60 = vmul.f32 %v1239_v58, %v1236_v57 }
0x1241   :  { %v2360_v61 = vadd.f32 %v1242_v59, %v1241_v60 }
0x1243   :  { %1245 = vrot.lane.b32.xlu0 %v2360_v61, %s2015_s19 }
0x12b5   :  { %v1246_v62 = vpop.permute.xlu0 %1245 }
0x12b6   :  { %1664 = vst.msk [vmem:[%s2426_s9 + $0x4] sm:$0x3] %vm462_vm4, %v1246_v62  ;;  %1839 = vmatmul.mubr.msk.f32.vlgmr.msra.gmra.mrb[8].mxu1 %vm51_vm1, %v1246_v62 }
0x12b7   :  { %1931 = vmatpush3.bf16.msra.mxu1 %v2155_v63  ;;  %1860 = vmatprep.mubr.msk.f32.mxu1 %vm2010_vm0, %v2011_v4 }
0x12b8   :  { %1932 = vmatprep.subr.bf16.mxu1 %v2009_v0 }
0x12bb   :  { %1934 = vmatpush3.bf16.msra.mxu1 %v2161_v2 }
0x12be   :  { %1861 = vmatmul.mubr.msk.f32.vlgmr.msra.gmra.mrb[10].mxu1 %vm51_vm1, %v1246_v62 }
0x1389   :  { %v1318_v13 = vpop.f32.mrb[8].mxu1 }
0x138a   :  { %v1329_v1 = vrot.slane %v1318_v13, %v2102_v14  ;;  %v1840_v3 = vpop.f32.mrb[9].mxu1 }
0x138c   :  { %v1330_v6 = vcombine.high %v1329_v1, %v1329_v1  ;;  %v1337_v9 = vrot.slane %v1329_v1, %v2102_v14 }
0x138e   :  { %v1344_v10 = vrot.slane %v1330_v6, %v2102_v14  ;;  %v1348_v63 = vrot.slane %v1337_v9, %v2105_v17 }
0x1390   :  { %v1352_v11 = vrot.slane %v1344_v10, %v2105_v17  ;;  %v1355_v4 = vadd.f32 %v1348_v63, %v2111_v21 }
0x1391   :  { %v1607_v0 = vpop.f32.mrb[10].mxu1 }
0x1392   :  { %v1356_v2 = vadd.f32 %v1352_v11, %v2118_v24  ;;  %1993 = vtanh.f32 %v1355_v4  ;;  %v1862_v12 = vpop.f32.mrb[11].mxu1 }
0x1394   :  { %1995 = vtanh.f32 %v1356_v2 }
0x139c   :  { %v1994_v15 = vpop.eup %1993 }
0x139d   :  { %v1359_v18 = vmul.f32 %v1994_v15, %v2126_v28 }
0x139e   :  { %v1996_v16 = vpop.eup %1995 }
0x139f   :  { %v1361_v19 = vsel %vm51_vm1, %v1359_v18, 0.0  ;;  %v1360_v14 = vmul.f32 %v1996_v16, %v2126_v28 }
0x13a0   :  { %1362 = vadd.xlane.f32.xlu0 %v1361_v19 }
0x13a1   :  { %v1364_v8 = vsel %vm51_vm1, %v1360_v14, 0.0 }
0x13a2   :  { %1365 = vadd.xlane.f32.xlu1 %v1364_v8 }
0x142d   :  { %v1363_v22 = vpop.xlane.xlu0 %1362 }
0x142e   :  { %v1372_v23 = vrot.slane %v1363_v22, %v2132_v37 }
0x142f   :  { %v1366_v21 = vpop.xlane.xlu1 %1365 }
0x1430   :  { %v1376_v24 = vrot.slane %v1366_v21, %v2132_v37 }
0x1432   :  { %v1377_v27 = vsel %vm188_vm2, %v1376_v24, %v1372_v23 }
0x1433   :  { %v1379_v20 = vsel %vm191_vm3, %v1377_v27, -inf }
0x1434   :  { %1380 = vmax.xlane.f32.xlu0 %v1379_v20 }
0x14c1   :  { %v1381_v29 = vpop.xlane.xlu0 %1380 }
0x14c2   :  { %v1386_v32 = vrot.slane %v1381_v29, %v2105_v17  ;;  %v1390_v28 = vrot.slane %v1381_v29, %v2138_v44 }
0x14c4   :  { %v1393_v25 = vsub.f32 %v1363_v22, %v1386_v32  ;;  %v1394_v33 = vsub.f32 %v1366_v21, %v1390_v28 }
0x14c6   :  { %v1395_v35 = vmul.f32 1.442695, %v1393_v25  ;;  %v1397_v38 = vmul.f32 1.442695, %v1394_v33 }
0x14c8   :  { %1997 = vpow2.f32 %v1395_v35 }
0x14c9   :  { %1999 = vpow2.f32 %v1397_v38 }
0x14d2   :  { %v1998_v39 = vpop.eup %1997 }
0x14d3   :  { %v2000_v30 = vpop.eup %1999  ;;  %1402 = vperm.xlu0 %1944, %v1998_v39  }
0x14d4   :  { %1405 = vperm.xlu1 %1943, %v2000_v30  }
0x1552   :  { %v1403_v40 = vpop.permute.xlu0 %1402 }
0x1553   :  { %v1406_v41 = vpop.permute.xlu1 %1405  ;;  %v1410_v42 = vrot.slane %v1403_v40, %v2132_v37 }
0x1554   :  { %v1414_v43 = vrot.slane %v1406_v41, %v2132_v37  ;;  %v1608_v37 = vadd.f32 %v2199_v26, %v1607_v0 }
0x1556   :  { %v1415_v45 = vsel %vm188_vm2, %v1414_v43, %v1410_v42 }
0x1557   :  { %v1417_v46 = vsel %vm191_vm3, %v1415_v45, 0.0 }
0x1558   :  { %1418 = vadd.xlane.f32.xlu0 %v1417_v46 }
0x15e5   :  { %v1419_v36 = vpop.xlane.xlu0 %1418 }
0x15e6   :  { %2001 = vrcp.f32 %v1419_v36 }
0x15f0   :  { %v2002_v47 = vpop.eup %2001 }
0x15f1   :  { %v1421_v48 = vmul.f32 %v2002_v47, %v1419_v36 }
0x15f3   :  { %v1422_v49 = vsub.f32 2.0, %v1421_v48 }
0x15f5   :  { %v1423_v50 = vmul.f32 %v2002_v47, %v1422_v49 }
0x15f7   :  { %v1428_v5 = vrot.slane %v1423_v50, %v2105_v17  ;;  %v1432_v51 = vrot.slane %v1423_v50, %v2138_v44 }
0x15f9   :  { %v1435_v52 = vmul.f32 %v1998_v39, %v1428_v5  ;;  %v1436_v53 = vmul.f32 %v2000_v30, %v1432_v51 }
0x15fb   :  { %1439 = vperm.xlu1 %1943, %v1435_v52  }
0x15ff   :  { %1444 = vperm.xlu1 %1943, %v1436_v53  }
0x1603   :  { %1619 = vrot.lane.b32.xlu1 %v1608_v37, %s2014_s6 }
0x167a   :  { %v1440_v54 = vpop.permute.xlu1 %1439 }
0x167b   :  { %v1447_v7 = vmul.f32 %v1440_v54, %v2206_v31 }
0x167d   :  { %v1449_v55 = vsel %vm51_vm1, %v1447_v7, 0.0 }
0x167e   :  { %v1450_v56 = vrot.slane %v1449_v55, 4  ;;  %v1445_v57 = vpop.permute.xlu1 %1444 }
0x167f   :  { %v1448_v58 = vmul.f32 %v1445_v57, %v2212_v34  ;;  %v1666_v34 = vld [vmem:[%s2425_s2 + $0x6] sm:$0x3] }
0x1680   :  { %v1451_v17 = vadd.f32 %v1450_v56, %v1449_v55 }
0x1681   :  { %v1456_v44 = vsel %vm51_vm1, %v1448_v58, 0.0 }
0x1682   :  { %v1452_v59 = vrot.slane %v1451_v17, 2  ;;  %v1457_v60 = vrot.slane %v1456_v44, 4  ;;  %v1620_v16 = vpop.permute.xlu1 %1619 }
0x1684   :  { %v1453_v62 = vadd.f32 %v1452_v59, %v1451_v17  ;;  %v1458_v13 = vadd.f32 %v1457_v60, %v1456_v44 }
0x1686   :  { %v1459_v1 = vrot.slane %v1458_v13, 2  ;;  %v1454_v26 = vrot.slane %v1453_v62, 1 }
0x1688   :  { %v1460_v3 = vadd.f32 %v1459_v1, %v1458_v13  ;;  %v1455_v9 = vadd.f32 %v1454_v26, %v1453_v62 }
0x168a   :  { %v1461_v6 = vrot.slane %v1460_v3, 1 }
0x168c   :  { %v1462_v10 = vadd.f32 %v1461_v6, %v1460_v3 }
0x168e   :  { %v1467_v31 = vsel %vm188_vm2, %v1462_v10, %v1455_v9 }
0x168f   :  { %1850 = vmatmul.mubr.msk.f32.vlgmr.msra.gmra.mrb[10].mxu0 %vm51_vm1, %v1467_v31 }
0x1762   :  { %v1536_v63 = vpop.f32.mrb[10].mxu0 }
0x1763   :  { %v1540_v11 = vadd.f32 %v1666_v34, %v1536_v63  ;;  %v1851_v4 = vpop.f32.mrb[11].mxu0 }
0x1765   :  { %v1611_v0 = vadd.f32 %v1608_v37, %v1540_v11 }
0x1767   :  { %v1669_v2 = vmul.f32 -1.442695, %v1611_v0 }
0x1769   :  { %2003 = vpow2.f32 %v1669_v2 }
0x1773   :  { %v2004_v12 = vpop.eup %2003 }
0x1774   :  { %v1615_v15 = vadd.f32 1.0, %v2004_v12 }
0x1776   :  { %2005 = vrcp.f32 %v1615_v15 }
0x1780   :  { %v2006_v18 = vpop.eup %2005 }
0x1781   :  { %v1622_v19 = vmul.f32 %v2006_v18, %v1620_v16  ;;  %v1629_v21 = vsub.f32 1.0, %v2006_v18  ;;  %v1635_v24 = vmul.f32 %v2006_v18, %v2360_v61 }
0x1783   :  { %1624 = vrot.lane.b32.xlu1 %v1622_v19, %s2014_s6 }
0x17f5   :  { %v1625_v14 = vpop.permute.xlu1 %1624 }
0x17f6   :  { %v1627_v8 = vadd.f32 %v1625_v14, %v1540_v11 }
0x17f8   :  { %2007 = vtanh.f32 %v1627_v8 }
0x1802   :  { %v2008_v22 = vpop.eup %2007 }
0x1803   :  { %1631 = vrot.lane.b32.xlu1 %v2008_v22, %s2015_s19 }
0x1875   :  { %v1632_v23 = vpop.permute.xlu1 %1631 }
0x1876   :  { %v1634_v27 = vmul.f32 %v1632_v23, %v1629_v21 }
0x1878   :  { %v1636_v20 = vadd.f32 %v1635_v24, %v1634_v27 }
0x187a   :  { %1638 = vrot.lane.b32.xlu1 %v1636_v20, %s2015_s19 }
0x18ec   :  { %v1639_v29 = vpop.permute.xlu1 %1638 }
0x18ed   :  { %1670 = vst.msk [vmem:[%s2426_s9 + $0x6] sm:$0x3] %vm462_vm4, %v1639_v29 }

</bundles_post_ra>
